<compile_context>
chip_gen: v6e
topology: v6e:2x2x1
jax: 0.10.0
libtpu: 0.0.40
codegen_flags: <defaults>
</compile_context>

<pallas_src>
import functools

import jax
import jax.numpy as jnp
from jax.experimental import pallas as pl
from jax.experimental.pallas import tpu as pltpu

KERNEL_SIZES = (1, 2, 3, 5, 10)           # feature_kernel keys
CHANNELS = 64                             # feature_kernel values
FEAT_DIM = CHANNELS * len(KERNEL_SIZES)   # 320 = mlp_input_shape
MAXK = max(KERNEL_SIZES)                  # 10
PAD_ROWS = 16                             # >= MAXK-1, multiple of 8 (cheap sublane alignment)
DOMAIN_NUM = 3
OUT_PAD = 128                             # lane-dense head-output width


# ----------------------------------------------------------------------------
# The fused kernel: LayerNorm -> fused conv + max-pool -> fused MLP heads
# One program per branch (text / entity).
# ----------------------------------------------------------------------------
def _fused_kernel(B, L, x_ref, lng_ref, lnb_ref, cw_ref, cadd_ref,
                  hw1_ref, hb1_ref, hw2_ref, hb2_ref, out_ref):
    BL = B * L
    x = x_ref[0]                                            # [B*L + PAD_ROWS, E] f32

    # BERT embedding LayerNorm (eps = 1e-12).  The trailing zero-pad rows produce harmless
    # finite garbage; every position that reads them is masked before the max-pool.
    mean = jnp.mean(x, axis=-1, keepdims=True)
    var = jnp.mean((x - mean) ** 2, axis=-1, keepdims=True)
    x = (x - mean) * jax.lax.rsqrt(var + 1e-12)
    x = x * lng_ref[...] + lnb_ref[...]

    # All five Conv1d's as 10 shifted taps against one fused [E, 320] RHS per tap (bf16 operands,
    # f32 accumulate).  Weights for tap j >= kernel_size are zero, so columns of each kernel-size
    # segment only see their own taps.
    acc = jnp.zeros((BL, FEAT_DIM), jnp.float32)
    for j in range(MAXK):                                   # static unroll, 10 taps
        xs = x[j:j + BL, :].astype(jnp.bfloat16)
        acc = acc + jnp.dot(xs, cw_ref[0, j],
                            preferred_element_type=jnp.float32)
    acc = acc + cadd_ref[0]      # conv bias + (-1e30) invalid-window mask, pre-combined host-side

    # Global max-pool over each length-L sequence -> [B, 320]  (torch.max_pool1d(f, f.shape[-1]))
    pooled = jnp.concatenate(
        [jnp.max(acc[b * L:(b + 1) * L, :], axis=0, keepdims=True) for b in range(B)],
        axis=0)

    # Fused MLP heads.  BatchNorm1d (eval) is already folded into hw1 / hb1.
    # Text branch: [classifier | domain] side-by-side; entity branch: [entity_mlp | zeros].
    h = jnp.dot(pooled.astype(jnp.bfloat16), hw1_ref[0],
                preferred_element_type=jnp.float32) + hb1_ref[0]
    h = jnp.maximum(h, 0.0)                                  # ReLU (Dropout -> identity)
    out = jnp.dot(h.astype(jnp.bfloat16), hw2_ref[0],
                  preferred_element_type=jnp.float32) + hb2_ref[0]
    out_ref[0] = out                                         # single lane-dense [B, 128] store


def fused_forward_call(B, L, E, hidden):
    BLP = B * L + PAD_ROWS
    BL = B * L
    H2 = 2 * hidden
    kernel = functools.partial(_fused_kernel, B, L)
    return pl.pallas_call(
        kernel,
        out_shape=jax.ShapeDtypeStruct((2, B, OUT_PAD), jnp.float32),
        grid=(2,),
        in_specs=[
            pl.BlockSpec((1, BLP, E), lambda s: (s, 0, 0)),                # embeddings (text/ent)
            pl.BlockSpec((1, E), lambda s: (0, 0)),                        # LayerNorm gamma
            pl.BlockSpec((1, E), lambda s: (0, 0)),                        # LayerNorm beta
            pl.BlockSpec((1, MAXK, E, FEAT_DIM), lambda s: (s, 0, 0, 0)),  # fused conv weights
            pl.BlockSpec((1, BL, FEAT_DIM), lambda s: (s, 0, 0)),          # conv bias + mask
            pl.BlockSpec((1, FEAT_DIM, H2), lambda s: (s, 0, 0)),          # head W1 (BN folded)
            pl.BlockSpec((1, 1, H2), lambda s: (s, 0, 0)),                 # head b1
            pl.BlockSpec((1, H2, OUT_PAD), lambda s: (s, 0, 0)),           # head W2 (lane-padded)
            pl.BlockSpec((1, 1, OUT_PAD), lambda s: (s, 0, 0)),            # head b2
        ],
        out_specs=pl.BlockSpec((1, B, OUT_PAD), lambda s: (s, 0, 0)),
        compiler_params=pltpu.CompilerParams(dimension_semantics=("parallel",)),
    )


# ----------------------------------------------------------------------------
# Parameter init (deterministic random, no checkpoint) + host-side packing/folding
# ----------------------------------------------------------------------------
def init_params(key, vocab, max_pos, emb_dim, hidden, domain_num=DOMAIN_NUM):
    keys = iter(jax.random.split(key, 64))
    nxt = lambda: next(keys)
    p = {}
    p["word_emb"] = jax.random.normal(nxt(), (vocab, emb_dim), jnp.float32) * 0.02
    p["pos_emb"] = jax.random.normal(nxt(), (max_pos, emb_dim), jnp.float32) * 0.02
    p["type_emb"] = jax.random.normal(nxt(), (2, emb_dim), jnp.float32) * 0.02
    p["ln_g"] = jnp.ones((1, emb_dim), jnp.float32)
    p["ln_b"] = jnp.zeros((1, emb_dim), jnp.float32)

    def conv_params():
        ws, bs = [], []
        for ksz in KERNEL_SIZES:
            # PyTorch Conv1d weight is [C_out, C_in, k]; stored transposed as [k, C_in, C_out].
            ws.append(jax.random.normal(nxt(), (ksz, emb_dim, CHANNELS), jnp.float32) * 0.05)
            bs.append(jax.random.normal(nxt(), (1, CHANNELS), jnp.float32) * 0.01)
        return ws, bs

    p["text_conv_w"], p["text_conv_b"] = conv_params()
    p["ent_conv_w"], p["ent_conv_b"] = conv_params()

    def mlp_params(out_dim):
        return dict(
            w1=jax.random.normal(nxt(), (FEAT_DIM, hidden), jnp.float32) * 0.05,
            b1=jax.random.normal(nxt(), (1, hidden), jnp.float32) * 0.01,
            g1=jnp.ones((1, hidden), jnp.float32),
            be1=jnp.zeros((1, hidden), jnp.float32),
            w2=jax.random.normal(nxt(), (hidden, out_dim), jnp.float32) * 0.05,
            b2=jnp.zeros((1, out_dim), jnp.float32),
        )

    p["classifier"] = mlp_params(1)
    p["domain"] = mlp_params(domain_num)
    p["entity_mlp"] = mlp_params(1)
    return p


def _fuse_conv(ws, bs):
    """Per-kernel-size [k,E,C] weights -> one [MAXK, E, 320] bf16 weight + [1, 320] f32 bias."""
    E = ws[0].shape[1]
    wf = jnp.zeros((MAXK, E, FEAT_DIM), jnp.float32)
    bias = jnp.zeros((1, FEAT_DIM), jnp.float32)
    for idx, (ksz, w, b) in enumerate(zip(KERNEL_SIZES, ws, bs)):
        wf = wf.at[:ksz, :, idx * CHANNELS:(idx + 1) * CHANNELS].set(w)
        bias = bias.at[:, idx * CHANNELS:(idx + 1) * CHANNELS].set(b)
    return wf.astype(jnp.bfloat16), bias


def _conv_add_term(bias, B, L):
    """Conv bias combined with a -1e30 mask for positions past each kernel's valid window."""
    col_valid = jnp.concatenate(
        [jnp.full((CHANNELS,), L - k + 1, jnp.int32) for k in KERNEL_SIZES])     # [320]
    rows = jnp.arange(L, dtype=jnp.int32)[:, None]                               # [L, 1]
    mask = jnp.where(rows < col_valid[None, :], 0.0, -1e30).astype(jnp.float32)  # [L, 320]
    return jnp.tile(mask, (B, 1)) + bias                                         # [B*L, 320]


def _fold_bn(w1, b1, g, be):
    # BatchNorm1d eval with running_mean=0, running_var=1: y = x * g/sqrt(1+eps) + be
    s = g / jnp.sqrt(1.0 + 1e-5)
    return w1 * s, b1 * s + be


def pack_params(p, B, L, hidden):
    """Host-side folding / fusing of all kernel weights (done once)."""
    assert L >= MAXK, f"seq_len must be >= {MAXK} (largest conv kernel size), got {L}"
    H = hidden
    packed = {"B": B, "L": L, "hidden": hidden}

    wt, bt = _fuse_conv(p["text_conv_w"], p["text_conv_b"])
    we, be_ = _fuse_conv(p["ent_conv_w"], p["ent_conv_b"])
    packed["conv_w"] = jnp.stack([wt, we])                                   # [2,10,E,320] bf16
    packed["conv_add"] = jnp.stack([_conv_add_term(bt, B, L),
                                    _conv_add_term(be_, B, L)])              # [2,B*L,320] f32

    cp, dp, ep = p["classifier"], p["domain"], p["entity_mlp"]
    cw1, cb1 = _fold_bn(cp["w1"], cp["b1"], cp["g1"], cp["be1"])
    dw1, db1 = _fold_bn(dp["w1"], dp["b1"], dp["g1"], dp["be1"])
    ew1, eb1 = _fold_bn(ep["w1"], ep["b1"], ep["g1"], ep["be1"])

    # Branch 0 (text): classifier | domain side-by-side.  Branch 1 (entity): entity_mlp | zeros.
    w1_text = jnp.concatenate([cw1, dw1], axis=1)                            # [320, 2H]
    b1_text = jnp.concatenate([cb1, db1], axis=1)                            # [1, 2H]
    w1_ent = jnp.concatenate([ew1, jnp.zeros_like(ew1)], axis=1)
    b1_ent = jnp.concatenate([eb1, jnp.zeros_like(eb1)], axis=1)

    def second_layer(w_a, b_a, w_b=None, b_b=None):
        w = jnp.zeros((2 * H, OUT_PAD), jnp.float32)
        b = jnp.zeros((1, OUT_PAD), jnp.float32)
        na = w_a.shape[1]
        w = w.at[:H, 0:na].set(w_a)
        b = b.at[:, 0:na].set(b_a)
        if w_b is not None:
            nb = w_b.shape[1]
            w = w.at[H:, na:na + nb].set(w_b)
            b = b.at[:, na:na + nb].set(b_b)
        return w, b

    w2_text, b2_text = second_layer(cp["w2"], cp["b2"], dp["w2"], dp["b2"])  # cols [bias|domain]
    w2_ent, b2_ent = second_layer(ep["w2"], ep["b2"])                        # cols [entity]

    packed["head_w1"] = jnp.stack([w1_text, w1_ent]).astype(jnp.bfloat16)    # [2, 320, 2H]
    packed["head_b1"] = jnp.stack([b1_text, b1_ent]).astype(jnp.float32)     # [2, 1, 2H]
    packed["head_w2"] = jnp.stack([w2_text, w2_ent]).astype(jnp.bfloat16)    # [2, 2H, 128]
    packed["head_b2"] = jnp.stack([b2_text, b2_ent]).astype(jnp.float32)     # [2, 1, 128]
    return packed


# ----------------------------------------------------------------------------
# Forward wrapper
# ----------------------------------------------------------------------------
def bert_embed(ids, p):
    """word + position + token_type embedding sum (LayerNorm is done inside the kernel)."""
    # TODO(synk): embedding-table gather has no tiny-Pallas win here; kept in plain JAX.
    L = ids.shape[1]
    return (p["word_emb"][ids]
            + p["pos_emb"][:L][None, :, :]
            + p["type_emb"][0][None, None, :])


def eann_endef_forward(alpha, content, entity, params, packed):
    # `alpha` only scales gradients in ReverseLayerF.backward; forward is identity -> unused.
    del alpha
    B, L = content.shape
    assert (B, L) == (packed["B"], packed["L"])
    E = params["word_emb"].shape[1]
    BL = B * L

    pad = jnp.zeros((PAD_ROWS, E), jnp.float32)
    x_text = jnp.concatenate([bert_embed(content, params).reshape(BL, E), pad], axis=0)
    x_ent = jnp.concatenate([bert_embed(entity, params).reshape(BL, E), pad], axis=0)
    x = jnp.stack([x_text, x_ent])                         # [2, B*L + PAD_ROWS, E]

    call = fused_forward_call(B, L, E, packed["hidden"])
    out = call(x, params["ln_g"], params["ln_b"],
               packed["conv_w"], packed["conv_add"],
               packed["head_w1"], packed["head_b1"],
               packed["head_w2"], packed["head_b2"])       # [2, B, 128]

    bias_pred = out[0, :, 0]                               # classifier(feature).squeeze(1)
    domain_pred = out[0, :, 1:1 + DOMAIN_NUM]              # domain_classifier(reverse(feature))
    entity_prob = out[1, :, 0]                             # entity_net(entity_feature).squeeze(1)

    mixed = jax.nn.sigmoid(0.9 * bias_pred + 0.1 * entity_prob)
    return mixed, jax.nn.sigmoid(entity_prob), domain_pred, jax.nn.sigmoid(bias_pred)


if __name__ == "__main__":
    B, L, E, VOCAB, HIDDEN = 2, 16, 32, 100, 64   # emb_dim=32, mlp_dims=(64,)
    key = jax.random.PRNGKey(0)
    kp, kc, ke = jax.random.split(key, 3)

    params = init_params(kp, vocab=VOCAB, max_pos=64, emb_dim=E, hidden=HIDDEN)
    packed = pack_params(params, B, L, HIDDEN)
    content = jax.random.randint(kc, (B, L), 0, VOCAB, dtype=jnp.int32)
    entity = jax.random.randint(ke, (B, L), 0, VOCAB, dtype=jnp.int32)

    outs = eann_endef_forward(1.0, content, entity, params, packed)
    outs = jax.block_until_ready(outs)

    assert outs[0].shape == (B,) and outs[1].shape == (B,)
    assert outs[2].shape == (B, DOMAIN_NUM) and outs[3].shape == (B,)
    print("KERNEL_OK")
</pallas_src>

<mosaic_0001>
module attributes {stable_mosaic.version = 11 : i64} {
  func.func @_fused_kernel(%arg0: i32, %arg1: memref<1x48x32xf32, #tpu.memory_space<vmem>>, %arg2: memref<1x32xf32, #tpu.memory_space<vmem>>, %arg3: memref<1x32xf32, #tpu.memory_space<vmem>>, %arg4: memref<1x10x32x320xbf16, #tpu.memory_space<vmem>>, %arg5: memref<1x32x320xf32, #tpu.memory_space<vmem>>, %arg6: memref<1x320x128xbf16, #tpu.memory_space<vmem>>, %arg7: memref<1x1x128xf32, #tpu.memory_space<vmem>>, %arg8: memref<1x128x128xbf16, #tpu.memory_space<vmem>>, %arg9: memref<1x1x128xf32, #tpu.memory_space<vmem>>, %arg10: memref<1x2x128xf32, #tpu.memory_space<vmem>>) attributes {dimension_semantics = [#tpu.dimension_semantics<parallel>], iteration_bounds = array<i64: 2>, scalar_prefetch = 0 : i64, scratch_operands = 0 : i64, tpu.core_type = #tpu.core_type<tc>, window_params = [{transform_indices = @transform_0, window_bounds = array<i64: 1, 48, 32>}, {pipeline_mode = #tpu.pipeline_mode<synchronous>, transform_indices = @transform_1, window_bounds = array<i64: 1, 32>}, {pipeline_mode = #tpu.pipeline_mode<synchronous>, transform_indices = @transform_2, window_bounds = array<i64: 1, 32>}, {transform_indices = @transform_3, window_bounds = array<i64: 1, 10, 32, 320>}, {transform_indices = @transform_4, window_bounds = array<i64: 1, 32, 320>}, {transform_indices = @transform_5, window_bounds = array<i64: 1, 320, 128>}, {transform_indices = @transform_6, window_bounds = array<i64: 1, 1, 128>}, {transform_indices = @transform_7, window_bounds = array<i64: 1, 128, 128>}, {transform_indices = @transform_8, window_bounds = array<i64: 1, 1, 128>}, {transform_indices = @transform_9, window_bounds = array<i64: 1, 2, 128>}]} {
    %c0 = arith.constant 0 : index
    %c0_0 = arith.constant 0 : index
    %c0_1 = arith.constant 0 : index
    %0 = vector.load %arg1[%c0, %c0_0, %c0_1] : memref<1x48x32xf32, #tpu.memory_space<vmem>>, vector<1x48x32xf32>
    %1 = vector.shape_cast %0 : vector<1x48x32xf32> to vector<48x32xf32>
    %cst = arith.constant dense<0.000000e+00> : vector<48xf32>
    %2 = vector.multi_reduction <add>, %1, %cst [1] : vector<48x32xf32> to vector<48xf32>
    %3 = vector.shape_cast %2 : vector<48xf32> to vector<48x1xf32>
    %cst_2 = arith.constant 3.200000e+01 : f32
    %4 = vector.broadcast %cst_2 : f32 to vector<48x1xf32>
    %5 = arith.divf %3, %4 : vector<48x1xf32>
    %6 = vector.broadcast %5 : vector<48x1xf32> to vector<48x32xf32>
    %7 = arith.subf %1, %6 : vector<48x32xf32>
    %8 = arith.mulf %7, %7 : vector<48x32xf32>
    %cst_3 = arith.constant dense<0.000000e+00> : vector<48xf32>
    %9 = vector.multi_reduction <add>, %8, %cst_3 [1] : vector<48x32xf32> to vector<48xf32>
    %10 = vector.shape_cast %9 : vector<48xf32> to vector<48x1xf32>
    %cst_4 = arith.constant 3.200000e+01 : f32
    %11 = vector.broadcast %cst_4 : f32 to vector<48x1xf32>
    %12 = arith.divf %10, %11 : vector<48x1xf32>
    %13 = vector.broadcast %5 : vector<48x1xf32> to vector<48x32xf32>
    %14 = arith.subf %1, %13 : vector<48x32xf32>
    %cst_5 = arith.constant 9.99999996E-13 : f32
    %15 = vector.broadcast %cst_5 : f32 to vector<48x1xf32>
    %16 = arith.addf %12, %15 : vector<48x1xf32>
    %17 = math.rsqrt %16 : vector<48x1xf32>
    %18 = vector.broadcast %17 : vector<48x1xf32> to vector<48x32xf32>
    %19 = arith.mulf %14, %18 : vector<48x32xf32>
    %c0_6 = arith.constant 0 : index
    %c0_7 = arith.constant 0 : index
    %20 = vector.load %arg2[%c0_6, %c0_7] : memref<1x32xf32, #tpu.memory_space<vmem>>, vector<1x32xf32>
    %21 = vector.broadcast %20 : vector<1x32xf32> to vector<48x32xf32>
    %22 = arith.mulf %19, %21 : vector<48x32xf32>
    %c0_8 = arith.constant 0 : index
    %c0_9 = arith.constant 0 : index
    %23 = vector.load %arg3[%c0_8, %c0_9] : memref<1x32xf32, #tpu.memory_space<vmem>>, vector<1x32xf32>
    %24 = vector.broadcast %23 : vector<1x32xf32> to vector<48x32xf32>
    %25 = arith.addf %22, %24 : vector<48x32xf32>
    %cst_10 = arith.constant 0.000000e+00 : f32
    %26 = vector.broadcast %cst_10 : f32 to vector<32x320xf32>
    %27 = vector.extract_strided_slice %25 {offsets = [0, 0], sizes = [32, 32], strides = [1, 1]} : vector<48x32xf32> to vector<32x32xf32>
    %28 = arith.truncf %27 : vector<32x32xf32> to vector<32x32xbf16>
    %c0_11 = arith.constant 0 : index
    %c0_12 = arith.constant 0 : index
    %c0_13 = arith.constant 0 : index
    %c0_14 = arith.constant 0 : index
    %29 = vector.load %arg4[%c0_11, %c0_12, %c0_13, %c0_14] : memref<1x10x32x320xbf16, #tpu.memory_space<vmem>>, vector<1x1x32x320xbf16>
    %30 = vector.shape_cast %29 : vector<1x1x32x320xbf16> to vector<32x320xbf16>
    %cst_15 = arith.constant dense<0.000000e+00> : vector<32x320xf32>
    %31 = tpu.matmul %28, %30, %cst_15 {dimension_numbers = #tpu.dot_dimension_numbers<[1], [0], [0], [1], [0, 0, 1, 1], [], []>} : vector<32x32xbf16>, vector<32x320xbf16>, vector<32x320xf32> -> vector<32x320xf32>
    %32 = arith.addf %26, %31 : vector<32x320xf32>
    %33 = vector.extract_strided_slice %25 {offsets = [1, 0], sizes = [32, 32], strides = [1, 1]} : vector<48x32xf32> to vector<32x32xf32>
    %34 = arith.truncf %33 : vector<32x32xf32> to vector<32x32xbf16>
    %c0_16 = arith.constant 0 : index
    %c1 = arith.constant 1 : index
    %c0_17 = arith.constant 0 : index
    %c0_18 = arith.constant 0 : index
    %35 = vector.load %arg4[%c0_16, %c1, %c0_17, %c0_18] : memref<1x10x32x320xbf16, #tpu.memory_space<vmem>>, vector<1x1x32x320xbf16>
    %36 = vector.shape_cast %35 : vector<1x1x32x320xbf16> to vector<32x320xbf16>
    %cst_19 = arith.constant dense<0.000000e+00> : vector<32x320xf32>
    %37 = tpu.matmul %34, %36, %cst_19 {dimension_numbers = #tpu.dot_dimension_numbers<[1], [0], [0], [1], [0, 0, 1, 1], [], []>} : vector<32x32xbf16>, vector<32x320xbf16>, vector<32x320xf32> -> vector<32x320xf32>
    %38 = arith.addf %32, %37 : vector<32x320xf32>
    %39 = vector.extract_strided_slice %25 {offsets = [2, 0], sizes = [32, 32], strides = [1, 1]} : vector<48x32xf32> to vector<32x32xf32>
    %40 = arith.truncf %39 : vector<32x32xf32> to vector<32x32xbf16>
    %c0_20 = arith.constant 0 : index
    %c2 = arith.constant 2 : index
    %c0_21 = arith.constant 0 : index
    %c0_22 = arith.constant 0 : index
    %41 = vector.load %arg4[%c0_20, %c2, %c0_21, %c0_22] : memref<1x10x32x320xbf16, #tpu.memory_space<vmem>>, vector<1x1x32x320xbf16>
    %42 = vector.shape_cast %41 : vector<1x1x32x320xbf16> to vector<32x320xbf16>
    %cst_23 = arith.constant dense<0.000000e+00> : vector<32x320xf32>
    %43 = tpu.matmul %40, %42, %cst_23 {dimension_numbers = #tpu.dot_dimension_numbers<[1], [0], [0], [1], [0, 0, 1, 1], [], []>} : vector<32x32xbf16>, vector<32x320xbf16>, vector<32x320xf32> -> vector<32x320xf32>
    %44 = arith.addf %38, %43 : vector<32x320xf32>
    %45 = vector.extract_strided_slice %25 {offsets = [3, 0], sizes = [32, 32], strides = [1, 1]} : vector<48x32xf32> to vector<32x32xf32>
    %46 = arith.truncf %45 : vector<32x32xf32> to vector<32x32xbf16>
    %c0_24 = arith.constant 0 : index
    %c3 = arith.constant 3 : index
    %c0_25 = arith.constant 0 : index
    %c0_26 = arith.constant 0 : index
    %47 = vector.load %arg4[%c0_24, %c3, %c0_25, %c0_26] : memref<1x10x32x320xbf16, #tpu.memory_space<vmem>>, vector<1x1x32x320xbf16>
    %48 = vector.shape_cast %47 : vector<1x1x32x320xbf16> to vector<32x320xbf16>
    %cst_27 = arith.constant dense<0.000000e+00> : vector<32x320xf32>
    %49 = tpu.matmul %46, %48, %cst_27 {dimension_numbers = #tpu.dot_dimension_numbers<[1], [0], [0], [1], [0, 0, 1, 1], [], []>} : vector<32x32xbf16>, vector<32x320xbf16>, vector<32x320xf32> -> vector<32x320xf32>
    %50 = arith.addf %44, %49 : vector<32x320xf32>
    %51 = vector.extract_strided_slice %25 {offsets = [4, 0], sizes = [32, 32], strides = [1, 1]} : vector<48x32xf32> to vector<32x32xf32>
    %52 = arith.truncf %51 : vector<32x32xf32> to vector<32x32xbf16>
    %c0_28 = arith.constant 0 : index
    %c4 = arith.constant 4 : index
    %c0_29 = arith.constant 0 : index
    %c0_30 = arith.constant 0 : index
    %53 = vector.load %arg4[%c0_28, %c4, %c0_29, %c0_30] : memref<1x10x32x320xbf16, #tpu.memory_space<vmem>>, vector<1x1x32x320xbf16>
    %54 = vector.shape_cast %53 : vector<1x1x32x320xbf16> to vector<32x320xbf16>
    %cst_31 = arith.constant dense<0.000000e+00> : vector<32x320xf32>
    %55 = tpu.matmul %52, %54, %cst_31 {dimension_numbers = #tpu.dot_dimension_numbers<[1], [0], [0], [1], [0, 0, 1, 1], [], []>} : vector<32x32xbf16>, vector<32x320xbf16>, vector<32x320xf32> -> vector<32x320xf32>
    %56 = arith.addf %50, %55 : vector<32x320xf32>
    %57 = vector.extract_strided_slice %25 {offsets = [5, 0], sizes = [32, 32], strides = [1, 1]} : vector<48x32xf32> to vector<32x32xf32>
    %58 = arith.truncf %57 : vector<32x32xf32> to vector<32x32xbf16>
    %c0_32 = arith.constant 0 : index
    %c5 = arith.constant 5 : index
    %c0_33 = arith.constant 0 : index
    %c0_34 = arith.constant 0 : index
    %59 = vector.load %arg4[%c0_32, %c5, %c0_33, %c0_34] : memref<1x10x32x320xbf16, #tpu.memory_space<vmem>>, vector<1x1x32x320xbf16>
    %60 = vector.shape_cast %59 : vector<1x1x32x320xbf16> to vector<32x320xbf16>
    %cst_35 = arith.constant dense<0.000000e+00> : vector<32x320xf32>
    %61 = tpu.matmul %58, %60, %cst_35 {dimension_numbers = #tpu.dot_dimension_numbers<[1], [0], [0], [1], [0, 0, 1, 1], [], []>} : vector<32x32xbf16>, vector<32x320xbf16>, vector<32x320xf32> -> vector<32x320xf32>
    %62 = arith.addf %56, %61 : vector<32x320xf32>
    %63 = vector.extract_strided_slice %25 {offsets = [6, 0], sizes = [32, 32], strides = [1, 1]} : vector<48x32xf32> to vector<32x32xf32>
    %64 = arith.truncf %63 : vector<32x32xf32> to vector<32x32xbf16>
    %c0_36 = arith.constant 0 : index
    %c6 = arith.constant 6 : index
    %c0_37 = arith.constant 0 : index
    %c0_38 = arith.constant 0 : index
    %65 = vector.load %arg4[%c0_36, %c6, %c0_37, %c0_38] : memref<1x10x32x320xbf16, #tpu.memory_space<vmem>>, vector<1x1x32x320xbf16>
    %66 = vector.shape_cast %65 : vector<1x1x32x320xbf16> to vector<32x320xbf16>
    %cst_39 = arith.constant dense<0.000000e+00> : vector<32x320xf32>
    %67 = tpu.matmul %64, %66, %cst_39 {dimension_numbers = #tpu.dot_dimension_numbers<[1], [0], [0], [1], [0, 0, 1, 1], [], []>} : vector<32x32xbf16>, vector<32x320xbf16>, vector<32x320xf32> -> vector<32x320xf32>
    %68 = arith.addf %62, %67 : vector<32x320xf32>
    %69 = vector.extract_strided_slice %25 {offsets = [7, 0], sizes = [32, 32], strides = [1, 1]} : vector<48x32xf32> to vector<32x32xf32>
    %70 = arith.truncf %69 : vector<32x32xf32> to vector<32x32xbf16>
    %c0_40 = arith.constant 0 : index
    %c7 = arith.constant 7 : index
    %c0_41 = arith.constant 0 : index
    %c0_42 = arith.constant 0 : index
    %71 = vector.load %arg4[%c0_40, %c7, %c0_41, %c0_42] : memref<1x10x32x320xbf16, #tpu.memory_space<vmem>>, vector<1x1x32x320xbf16>
    %72 = vector.shape_cast %71 : vector<1x1x32x320xbf16> to vector<32x320xbf16>
    %cst_43 = arith.constant dense<0.000000e+00> : vector<32x320xf32>
    %73 = tpu.matmul %70, %72, %cst_43 {dimension_numbers = #tpu.dot_dimension_numbers<[1], [0], [0], [1], [0, 0, 1, 1], [], []>} : vector<32x32xbf16>, vector<32x320xbf16>, vector<32x320xf32> -> vector<32x320xf32>
    %74 = arith.addf %68, %73 : vector<32x320xf32>
    %75 = vector.extract_strided_slice %25 {offsets = [8, 0], sizes = [32, 32], strides = [1, 1]} : vector<48x32xf32> to vector<32x32xf32>
    %76 = arith.truncf %75 : vector<32x32xf32> to vector<32x32xbf16>
    %c0_44 = arith.constant 0 : index
    %c8 = arith.constant 8 : index
    %c0_45 = arith.constant 0 : index
    %c0_46 = arith.constant 0 : index
    %77 = vector.load %arg4[%c0_44, %c8, %c0_45, %c0_46] : memref<1x10x32x320xbf16, #tpu.memory_space<vmem>>, vector<1x1x32x320xbf16>
    %78 = vector.shape_cast %77 : vector<1x1x32x320xbf16> to vector<32x320xbf16>
    %cst_47 = arith.constant dense<0.000000e+00> : vector<32x320xf32>
    %79 = tpu.matmul %76, %78, %cst_47 {dimension_numbers = #tpu.dot_dimension_numbers<[1], [0], [0], [1], [0, 0, 1, 1], [], []>} : vector<32x32xbf16>, vector<32x320xbf16>, vector<32x320xf32> -> vector<32x320xf32>
    %80 = arith.addf %74, %79 : vector<32x320xf32>
    %81 = vector.extract_strided_slice %25 {offsets = [9, 0], sizes = [32, 32], strides = [1, 1]} : vector<48x32xf32> to vector<32x32xf32>
    %82 = arith.truncf %81 : vector<32x32xf32> to vector<32x32xbf16>
    %c0_48 = arith.constant 0 : index
    %c9 = arith.constant 9 : index
    %c0_49 = arith.constant 0 : index
    %c0_50 = arith.constant 0 : index
    %83 = vector.load %arg4[%c0_48, %c9, %c0_49, %c0_50] : memref<1x10x32x320xbf16, #tpu.memory_space<vmem>>, vector<1x1x32x320xbf16>
    %84 = vector.shape_cast %83 : vector<1x1x32x320xbf16> to vector<32x320xbf16>
    %cst_51 = arith.constant dense<0.000000e+00> : vector<32x320xf32>
    %85 = tpu.matmul %82, %84, %cst_51 {dimension_numbers = #tpu.dot_dimension_numbers<[1], [0], [0], [1], [0, 0, 1, 1], [], []>} : vector<32x32xbf16>, vector<32x320xbf16>, vector<32x320xf32> -> vector<32x320xf32>
    %86 = arith.addf %80, %85 : vector<32x320xf32>
    %c0_52 = arith.constant 0 : index
    %c0_53 = arith.constant 0 : index
    %c0_54 = arith.constant 0 : index
    %87 = vector.load %arg5[%c0_52, %c0_53, %c0_54] : memref<1x32x320xf32, #tpu.memory_space<vmem>>, vector<1x32x320xf32>
    %88 = vector.shape_cast %87 : vector<1x32x320xf32> to vector<32x320xf32>
    %89 = arith.addf %86, %88 : vector<32x320xf32>
    %90 = vector.extract_strided_slice %89 {offsets = [0, 0], sizes = [16, 320], strides = [1, 1]} : vector<32x320xf32> to vector<16x320xf32>
    %cst_55 = arith.constant dense<0xFF800000> : vector<320xf32>
    %91 = vector.multi_reduction <maximumf>, %90, %cst_55 [0] : vector<16x320xf32> to vector<320xf32>
    %92 = vector.shape_cast %91 : vector<320xf32> to vector<1x320xf32>
    %93 = vector.extract_strided_slice %89 {offsets = [16, 0], sizes = [16, 320], strides = [1, 1]} : vector<32x320xf32> to vector<16x320xf32>
    %cst_56 = arith.constant dense<0xFF800000> : vector<320xf32>
    %94 = vector.multi_reduction <maximumf>, %93, %cst_56 [0] : vector<16x320xf32> to vector<320xf32>
    %95 = vector.shape_cast %94 : vector<320xf32> to vector<1x320xf32>
    %96 = tpu.concatenate %92, %95 in 0 : vector<1x320xf32>, vector<1x320xf32> -> vector<2x320xf32>
    %97 = arith.truncf %96 : vector<2x320xf32> to vector<2x320xbf16>
    %c0_57 = arith.constant 0 : index
    %c0_58 = arith.constant 0 : index
    %c0_59 = arith.constant 0 : index
    %98 = vector.load %arg6[%c0_57, %c0_58, %c0_59] : memref<1x320x128xbf16, #tpu.memory_space<vmem>>, vector<1x320x128xbf16>
    %99 = vector.shape_cast %98 : vector<1x320x128xbf16> to vector<320x128xbf16>
    %cst_60 = arith.constant dense<0.000000e+00> : vector<2x128xf32>
    %100 = tpu.matmul %97, %99, %cst_60 {dimension_numbers = #tpu.dot_dimension_numbers<[1], [0], [0], [1], [0, 0, 1, 1], [], []>} : vector<2x320xbf16>, vector<320x128xbf16>, vector<2x128xf32> -> vector<2x128xf32>
    %c0_61 = arith.constant 0 : index
    %c0_62 = arith.constant 0 : index
    %c0_63 = arith.constant 0 : index
    %101 = vector.load %arg7[%c0_61, %c0_62, %c0_63] : memref<1x1x128xf32, #tpu.memory_space<vmem>>, vector<1x1x128xf32>
    %102 = vector.shape_cast %101 : vector<1x1x128xf32> to vector<1x128xf32>
    %103 = vector.broadcast %102 : vector<1x128xf32> to vector<2x128xf32>
    %104 = arith.addf %100, %103 : vector<2x128xf32>
    %cst_64 = arith.constant 0.000000e+00 : f32
    %105 = vector.broadcast %cst_64 : f32 to vector<2x128xf32>
    %106 = arith.maximumf %104, %105 : vector<2x128xf32>
    %107 = arith.truncf %106 : vector<2x128xf32> to vector<2x128xbf16>
    %c0_65 = arith.constant 0 : index
    %c0_66 = arith.constant 0 : index
    %c0_67 = arith.constant 0 : index
    %108 = vector.load %arg8[%c0_65, %c0_66, %c0_67] : memref<1x128x128xbf16, #tpu.memory_space<vmem>>, vector<1x128x128xbf16>
    %109 = vector.shape_cast %108 : vector<1x128x128xbf16> to vector<128x128xbf16>
    %cst_68 = arith.constant dense<0.000000e+00> : vector<2x128xf32>
    %110 = tpu.matmul %107, %109, %cst_68 {dimension_numbers = #tpu.dot_dimension_numbers<[1], [0], [0], [1], [0, 0, 1, 1], [], []>} : vector<2x128xbf16>, vector<128x128xbf16>, vector<2x128xf32> -> vector<2x128xf32>
    %c0_69 = arith.constant 0 : index
    %c0_70 = arith.constant 0 : index
    %c0_71 = arith.constant 0 : index
    %111 = vector.load %arg9[%c0_69, %c0_70, %c0_71] : memref<1x1x128xf32, #tpu.memory_space<vmem>>, vector<1x1x128xf32>
    %112 = vector.shape_cast %111 : vector<1x1x128xf32> to vector<1x128xf32>
    %113 = vector.broadcast %112 : vector<1x128xf32> to vector<2x128xf32>
    %114 = arith.addf %110, %113 : vector<2x128xf32>
    %c0_72 = arith.constant 0 : index
    %c0_73 = arith.constant 0 : index
    %c0_74 = arith.constant 0 : index
    %115 = vector.load %arg10[%c0_72, %c0_73, %c0_74] : memref<1x2x128xf32, #tpu.memory_space<vmem>>, vector<1x2x128xf32>
    %116 = vector.shape_cast %115 : vector<1x2x128xf32> to vector<2x128xf32>
    %117 = vector.shape_cast %114 : vector<2x128xf32> to vector<1x2x128xf32>
    tpu.vector_store %arg10[%c0_72, %c0_73, %c0_74], %117 {strides = array<i32>} : memref<1x2x128xf32, #tpu.memory_space<vmem>>, vector<1x2x128xf32>,
    return
  }
  func.func @transform_0(%arg0: i32) -> (i32, i32, i32) {
    %c0_i32 = arith.constant 0 : i32
    %c0_i32_0 = arith.constant 0 : i32
    %c0_i32_1 = arith.constant 0 : i32
    return %arg0, %c0_i32, %c0_i32_0 : i32, i32, i32
  }
  func.func @transform_1(%arg0: i32) -> (i32, i32) {
    %c0_i32 = arith.constant 0 : i32
    %c0_i32_0 = arith.constant 0 : i32
    %c0_i32_1 = arith.constant 0 : i32
    return %c0_i32, %c0_i32_0 : i32, i32
  }
  func.func @transform_2(%arg0: i32) -> (i32, i32) {
    %c0_i32 = arith.constant 0 : i32
    %c0_i32_0 = arith.constant 0 : i32
    %c0_i32_1 = arith.constant 0 : i32
    return %c0_i32, %c0_i32_0 : i32, i32
  }
  func.func @transform_3(%arg0: i32) -> (i32, i32, i32, i32) {
    %c0_i32 = arith.constant 0 : i32
    %c0_i32_0 = arith.constant 0 : i32
    %c0_i32_1 = arith.constant 0 : i32
    %c0_i32_2 = arith.constant 0 : i32
    return %arg0, %c0_i32, %c0_i32_0, %c0_i32_1 : i32, i32, i32, i32
  }
  func.func @transform_4(%arg0: i32) -> (i32, i32, i32) {
    %c0_i32 = arith.constant 0 : i32
    %c0_i32_0 = arith.constant 0 : i32
    %c0_i32_1 = arith.constant 0 : i32
    return %arg0, %c0_i32, %c0_i32_0 : i32, i32, i32
  }
  func.func @transform_5(%arg0: i32) -> (i32, i32, i32) {
    %c0_i32 = arith.constant 0 : i32
    %c0_i32_0 = arith.constant 0 : i32
    %c0_i32_1 = arith.constant 0 : i32
    return %arg0, %c0_i32, %c0_i32_0 : i32, i32, i32
  }
  func.func @transform_6(%arg0: i32) -> (i32, i32, i32) {
    %c0_i32 = arith.constant 0 : i32
    %c0_i32_0 = arith.constant 0 : i32
    %c0_i32_1 = arith.constant 0 : i32
    return %arg0, %c0_i32, %c0_i32_0 : i32, i32, i32
  }
  func.func @transform_7(%arg0: i32) -> (i32, i32, i32) {
    %c0_i32 = arith.constant 0 : i32
    %c0_i32_0 = arith.constant 0 : i32
    %c0_i32_1 = arith.constant 0 : i32
    return %arg0, %c0_i32, %c0_i32_0 : i32, i32, i32
  }
  func.func @transform_8(%arg0: i32) -> (i32, i32, i32) {
    %c0_i32 = arith.constant 0 : i32
    %c0_i32_0 = arith.constant 0 : i32
    %c0_i32_1 = arith.constant 0 : i32
    return %arg0, %c0_i32, %c0_i32_0 : i32, i32, i32
  }
  func.func @transform_9(%arg0: i32) -> (i32, i32, i32) {
    %c0_i32 = arith.constant 0 : i32
    %c0_i32_0 = arith.constant 0 : i32
    %c0_i32_1 = arith.constant 0 : i32
    return %arg0, %c0_i32, %c0_i32_0 : i32, i32, i32
  }
}

</mosaic_0001>

<bundles_post_ra>
// kernel: tpu_custom_call.1
= control target key start
LH: loop header
LB: loop body
LE: loop exit
PB: predicated region body
PF: predicated region fallthrough
CT: control target
= control target key end

     0   :  { %s4567_s0 = inlined_call_operand.vmem [shape: f32[2,48,32], index: 0, kind: input, shape index: {}]   ;;  %s4568_s1 = inlined_call_operand.vmem [shape: f32[1,32], index: 1, kind: input, shape index: {}]   ;;  %s4569_s2 = inlined_call_operand.vmem [shape: f32[1,32], index: 2, kind: input, shape index: {}]   ;;  %s4570_s3 = inlined_call_operand.hbm [shape: bf16[2,10,32,320], index: 3, kind: input, shape index: {}]   ;;  %s4571_s4 = inlined_call_operand.hbm [shape: f32[2,32,320], index: 4, kind: input, shape index: {}]   ;;  %s4572_s5 = inlined_call_operand.hbm [shape: bf16[2,320,128], index: 5, kind: input, shape index: {}]   ;;  %s4573_s6 = inlined_call_operand.vmem [shape: f32[2,1,128], index: 6, kind: input, shape index: {}]   ;;  %s4574_s7 = inlined_call_operand.vmem [shape: bf16[2,128,128], index: 7, kind: input, shape index: {}]   ;;  %s4575_s8 = inlined_call_operand.vmem [shape: f32[2,1,128], index: 8, kind: input, shape index: {}]   ;;  %s4576_s9 = inlined_call_operand.hbm [shape: f32[2,2,128], index: 9, kind: output, shape index: {}]  }
   0x1   :  { %4586 = sst [smem:[#allocation30_spill]] %s4570_s3 }
   0x2   :  { %4587 = sst [smem:[#allocation31_spill]] %s4571_s4 }
   0x3   :  { %14 = vsyncpa [#allocation3], 0 }
   0x4   :  { %16 = vsyncpa [#allocation3 + $0x1], 0 }
   0x5   :  { %17 = vsyncpa [#allocation6], 0 }
   0x6   :  { %19 = vsyncpa [#allocation6 + $0x1], 0 }
   0x7   :  { %20 = vsyncpa [#allocation4], 0 }
   0x8   :  { %22 = vsyncpa [#allocation4 + $0x1], 0  ;;  %s3728_s30 = smov 0   ;;  %s3730_s10 = smov 0  }
   0x9   :  { %s3732_s11 = smov 0   ;;  %s3734_s12 = smov 0  }
   0xa LB: > { %4588 = sst [smem:[#allocation12_spill]] %s3651_s30  ;;  %s3749_s13 = sadd.s32 4294967295, %s3663_s12   ;;  %s3663_s12 = sphi %s3734_s12, %s4636_s12   ;;  %s3659_s11 = sphi %s3732_s11, %s4638_s11   ;;  %s3655_s10 = sphi %s3730_s10, %s4640_s10   ;;  %s3651_s30 = sphi %s3728_s30, %s4639_s30  }
   0xb   : > { %4589 = sst [smem:[#allocation13_spill]] %s3659_s11  ;;  %s2907_s14 = sadd.s32 4294967294, %s3663_s12  }
   0xc   : > { %s3753_s15 = sadd.s32 1, %s3663_s12   ;;  %s103_s16 = sadd.s32 1, %s3659_s11 }
   0xd   : > { %4590 = sst [smem:[#allocation14_spill]] %s3753_s15  ;;  %s100_s17 = ssub.s32 %s3663_s12, %s3753_s15 }
   0xe   : > { %p110_p0 = scmp.ne.s32.totalorder %s3659_s11, %s3655_s10  ;;  %p101_p1 = scmp.eq.s32.totalorder %s100_s17, 0 }
   0xf   : > { %p111_p2 = scmp.eq.s32.totalorder %s3663_s12, 0  ;;  %p116_p3 = scmp.ne.s32.totalorder %s3655_s10, %s3651_s30 }
  0x10   : > { %p117_p4 = scmp.eq.s32.totalorder %s3749_s13, 0  ;;  %p270_p7 = scmp.eq.s32.totalorder %s3749_s13, 1 }
  0x11   : > { %s3765_s18 = scalar_select %p101_p1, %s3659_s11, %s103_s16  }
  0x12   : > { %p112_p5 = por %p111_p2, %p110_p0  ;;  %p3767_p6 = por %p117_p4, %p116_p3 }
  0x13   : > { %4591 = sst [smem:[#allocation15_spill]] %s3765_s18  ;;  %p276_p8 = scmp.eq.s32.totalorder %s2907_s14, 1 }
  0x14   : > { %s4592_s19 = scalar_select %p3767_p6, 1, 0 }
  0x15   : > { %p3348_p10 = scmp.lt.s32.totalorder %s3663_s12, 2  ;;  %p3774_p11 = por %p270_p7, %p110_p0 }
  0x16   : > { %p3778_p12 = por %p276_p8, %p116_p3  ;;  %s3783_s22 = sand.u32 1, %s3659_s11  }
  0x17   : > { %s4593_s20 = scalar_select %p3774_p11, 1, 0 }
  0x18   : > { %s4594_s21 = scalar_select %p3778_p12, 1, 0 }
  0x19   : > { %p3785_p13 = pnand %p3348_p10, %p112_p5  ;;  %s331_s24 = sand.u32 1, %s3663_s12  }
  0x1a   : > { %4595 = sst [smem:[#allocation16_spill]] %s4594_s21  ;;  %s3318_s25 = smul.u32 96, %s3783_s22 }
  0x1b   : > { %s3319_s26 = smul.u32 1536, %s3663_s12  ;;  %s4597_s4 = sld [smem:[#allocation31_spill]] }
  0x1c   : > { %s335_s27 = scalar_lea.vmem [#allocation5], %s3318_s25  ;;  %s3800_s17 = scalar_lea.sflag [#allocation6], %s331_s24 }
  0x1d   : > { %s342_s28 = sshll.u32 %s335_s27, 4  ;;  %p3806_p2 = pneg %p3785_p13  ;;  %s3797_s28 = int_to_ptr.vmem [resolvable:$true] %s342_s28 }
  0x21   : > { %s3795_s16 = scalar_lea.hbm %s4597_s4, %s3319_s26  ;;  %s3516_s27 = scalar_lea.hbm %s4597_s4, 3072 }
  0x22   : > { %s3511_s18 = scalar_lea.hbm %s3795_s16, 1536  ;;  %p3517_p5 = scmp.lt.s32.totalorder %s3795_s16, %s4597_s4 }
  0x23   : > { %p3512_p1 = scmp.ne.s32.totalorder %s3795_s16, %s3511_s18  ;;  %p3518_p7 = scmp.lt.s32.totalorder %s3516_s27, %s3511_s18 }
  0x25   : > { %p3514_p3 = pnand %p3806_p2, %p3512_p1  ;;  %p3519_p8 = por %p3518_p7, %p3517_p5 }
  0x27   : > { %p3515_p4 = pneg %p3514_p3 }
  0x29   : > { %p3520_p10 = pnand %p3519_p8, %p3515_p4 }
  0x2b   : > { %3523 = shalt.err (!%p3520_p10)
}
  0x2c   : > { %s3524_s24 = scalar_lea.vmem %s3797_s28, 1536  ;;  %s3665_s15 = smov [#allocation5]  }
  0x2d   : > { %p3525_p9 = scmp.ne.s32.totalorder %s3797_s28, %s3524_s24  ;;  %s3529_s25 = sshll.u32 %s3665_s15, 4  ;;  %s3530_s25 = int_to_ptr.vmem [resolvable:$false] %s3529_s25 }
  0x2e   : > { %s3531_s26 = scalar_lea.vmem %s3530_s25, 3072  ;;  %p3532_p0 = scmp.lt.s32.totalorder %s3797_s28, %s3530_s25 }
  0x2f   : > { %p3527_p1 = pnand %p3525_p9, %p3806_p2  ;;  %p3533_p12 = scmp.lt.s32.totalorder %s3531_s26, %s3524_s24 }
  0x31   : > { %p3528_p3 = pneg %p3527_p1  ;;  %p3534_p11 = por %p3533_p12, %p3532_p0 }
  0x33   : > { %p3535_p6 = pnand %p3534_p11, %p3528_p3 }
  0x35   : > { %3538 = shalt.err (!%p3535_p6)
}
  0x36   : > { %s3666_s18 = smov 384   ;;  %s3667_s15 = smov 24  }
  0x37   : > { %3340 = dma.hbm_to_vmem [thread:$0]  (!%p3785_p13), %s3795_s16, 1536, %s3797_s28, %s3800_s17, %s3666_s18, %s3666_s18, %s3667_s15  }
  0x38   : > { %p391_p9 = scmp.lt.s32.totalorder %s3663_s12, 3  ;;  %s3316_s27 = smul.u32 480, %s3783_s22 }
  0x39   : > { %p4599_p12 = scmp.ge.s32.totalorder %s3663_s12, 1  ;;  %s3317_s14 = smul.u32 7680, %s3663_s12 }
  0x3a   : > { %s4601_s3 = sld [smem:[#allocation30_spill]]  ;;  %s314_s4 = scalar_lea.vmem [#allocation2], %s3316_s27 }
  0x3b   : > { %p3833_p11 = pnand %p4599_p12, %p391_p9  ;;  %s321_s21 = sshll.u32 %s314_s4, 4  ;;  %s3843_s21 = int_to_ptr.vmem [resolvable:$true] %s321_s21 }
  0x3c   : > { %s3320_s28 = smul.u32 160, %s3783_s22  ;;  %s311_s16 = scalar_lea.sflag [#allocation3], %s3783_s22 }
  0x3d   : > { %s4600_s29 = scalar_select %p3833_p11, 1, 0 }
  0x40   : > { %s3841_s26 = scalar_lea.hbm %s4601_s3, %s3317_s14  ;;  %s3544_s24 = scalar_lea.hbm %s4601_s3, 15360 }
  0x41   : > { %s3539_s18 = scalar_lea.hbm %s3841_s26, 7680  ;;  %p3545_p5 = scmp.lt.s32.totalorder %s3841_s26, %s4601_s3 }
  0x42   : > { %p3540_p6 = scmp.ne.s32.totalorder %s3841_s26, %s3539_s18  ;;  %p3546_p7 = scmp.lt.s32.totalorder %s3544_s24, %s3539_s18 }
  0x44   : > { %p3542_p0 = pnand %p3540_p6, %p3806_p2  ;;  %p3547_p8 = por %p3546_p7, %p3545_p5 }
  0x46   : > { %p3543_p4 = pneg %p3542_p0 }
  0x48   : > { %p3548_p10 = pnand %p3547_p8, %p3543_p4 }
  0x4a   : > { %3551 = shalt.err (!%p3548_p10)
}
  0x4b   : > { %s3552_s4 = scalar_lea.vmem %s3843_s21, 7680  ;;  %s3668_s27 = smov [#allocation2]  }
  0x4c   : > { %p3553_p1 = scmp.ne.s32.totalorder %s3843_s21, %s3552_s4  ;;  %s3557_s30 = sshll.u32 %s3668_s27, 4  ;;  %s3558_s30 = int_to_ptr.vmem [resolvable:$false] %s3557_s30 }
  0x4d   : > { %s3559_s15 = scalar_lea.vmem %s3558_s30, 15360  ;;  %p3560_p12 = scmp.lt.s32.totalorder %s3843_s21, %s3558_s30 }
  0x4e   : > { %p3555_p3 = pnand %p3553_p1, %p3806_p2  ;;  %p3561_p6 = scmp.lt.s32.totalorder %s3559_s15, %s3552_s4 }
  0x50   : > { %p3556_p9 = pneg %p3555_p3  ;;  %p3562_p0 = por %p3561_p6, %p3560_p12 }
  0x52   : > { %p3563_p11 = pnand %p3562_p0, %p3556_p9 }
  0x54   : > { %3566 = shalt.err (!%p3563_p11)
}
  0x55   : > { %s3669_s18 = smov 192   ;;  %s3670_s24 = smov 12  }
  0x56   : > { %3337 = dma.hbm_to_vmem [thread:$0]  (!%p3785_p13), %s3841_s26, 7680, %s3843_s21, %s311_s16, %s3669_s18, %s3669_s18, %s3670_s24  }
  0x57   : > { %s3321_s14 = smul.u32 2560, %s3663_s12  ;;  %s356_s25 = scalar_lea.vmem [#allocation7], %s3320_s28 }
  0x58   : > { %s363_s27 = sshll.u32 %s356_s25, 4  ;;  %s3572_s22 = scalar_lea.hbm %s4572_s5, 5120  ;;  %s3877_s27 = int_to_ptr.vmem [resolvable:$true] %s363_s27 }
  0x59   : > { %s3875_s15 = scalar_lea.hbm %s4572_s5, %s3321_s14 }
  0x5a   : > { %s3567_s3 = scalar_lea.hbm %s3875_s15, 2560  ;;  %p3573_p7 = scmp.lt.s32.totalorder %s3875_s15, %s4572_s5 }
  0x5b   : > { %p3568_p11 = scmp.ne.s32.totalorder %s3875_s15, %s3567_s3  ;;  %p3574_p8 = scmp.lt.s32.totalorder %s3572_s22, %s3567_s3 }
  0x5d   : > { %p3570_p4 = pnand %p3568_p11, %p3806_p2  ;;  %p3575_p10 = por %p3574_p8, %p3573_p7 }
  0x5f   : > { %p3571_p5 = pneg %p3570_p4 }
  0x61   : > { %p3576_p1 = pnand %p3575_p10, %p3571_p5 }
  0x63   : > { %3579 = shalt.err (!%p3576_p1)
}
  0x64   : > { %s3580_s18 = scalar_lea.vmem %s3877_s27, 2560  ;;  %s3671_s24 = smov [#allocation7]  }
  0x65   : > { %p3581_p3 = scmp.ne.s32.totalorder %s3877_s27, %s3580_s18  ;;  %s3585_s14 = sshll.u32 %s3671_s24, 4  ;;  %s3586_s14 = int_to_ptr.vmem [resolvable:$false] %s3585_s14 }
  0x66   : > { %s3587_s25 = scalar_lea.vmem %s3586_s14, 5120  ;;  %p3588_p6 = scmp.lt.s32.totalorder %s3877_s27, %s3586_s14 }
  0x67   : > { %p3583_p9 = pnand %p3581_p3, %p3806_p2  ;;  %p3589_p0 = scmp.lt.s32.totalorder %s3587_s25, %s3580_s18 }
  0x69   : > { %p3584_p12 = pneg %p3583_p9  ;;  %p3590_p11 = por %p3589_p0, %p3588_p6 }
  0x6b   : > { %p3591_p4 = pnand %p3590_p11, %p3584_p12 }
  0x6d   : > { %3594 = shalt.err (!%p3591_p4)
}
  0x6e   : > { %s3672_s3 = smov 64   ;;  %s3673_s4 = smov 4  }
  0x6f   : > { %3343 = dma.hbm_to_vmem [thread:$0]  (!%p3785_p13), %s3875_s15, 2560, %s3877_s27, %s3800_s17, %s3672_s3, %s3672_s3, %s3673_s4  }
  0x70   : > { %p4602_p2 = scmp.ne.s32.totalorder %s4600_s29, 0 }
  0x72   : > { %395 = sbr.rel (%p4602_p2) target bundleno = 1243 (0x4db), region = 56 }
  0x77   : > { %s3903_s11 = sand.u32 1, %s3655_s10   ;;  %p4603_p5 = scmp.ne.s32.totalorder %s4592_s19, 0 }
  0x78   : > { %s3322_s30 = smul.u32 480, %s3903_s11  ;;  %s398_s21 = scalar_lea.sflag [#allocation3], %s3903_s11 }
  0x7a   : > { %s3907_s26 = scalar_lea.vmem [#allocation2], %s3322_s30 }
  0x7b   : > { %3638 = dma.done.wait (%p4603_p5), %s398_s21, 7680  }
  0x7c   : > { %3640 = vsyncadd (%p4603_p5), %s398_s21, 4294959616  ;;  %s406_s23 = sand.u32 1, %s3749_s13   ;;  %s3323_s17 = smul.u32 96, %s3903_s11 }
  0x7d   : > { %s407_s29 = scalar_lea.sflag [#allocation6], %s406_s23 }
  0x7e   : > { %s3915_s27 = scalar_lea.vmem [#allocation5], %s3323_s17 }
  0x7f   : > { %3642 = dma.done.wait (%p4603_p5), %s407_s29, 4096  }
  0x80   : > { %3644 = vsyncadd (%p4603_p5), %s407_s29, 4294963200  ;;  %p480_p13 = scmp.lt.s32.totalorder %s3749_s13, 1  ;;  %vm503_vm0 = vcmask 261120   ;;  %v3391_v37 = vld [vmem:[%s3907_s26 + $0x20] ss:$12 sps:$4 sm:$0xff]   ;;  %v3674_v44 = vmov 0  }
  0x81   : > { %3212 = vmatprep.subr.bf16.mxu0 %v3391_v37  ;;  %v3392_v38 = vld [vmem:[%s3907_s26 + $0x8] ss:$12 sps:$4 sm:$0xff]   ;;  %v3393_v39 = vld [vmem:[%s3907_s26 + $0x4c] ss:$12 sps:$4 sm:$0xff]   ;;  %v3401_v43 = vld [vmem:[%s3907_s26 + $0x30] ss:$12 sps:$4 sm:$0xff]   ;;  %720 = vmatprep.mubr.bf16.mxu1 %v3674_v44 }
  0x82   : > { %s3923_s15 = scalar_select %p480_p13, %s3749_s13, 1  ;;  %3213 = vmatpush3.bf16.msra.mxu0 %v3391_v37  ;;  %v3395_v40 = vld [vmem:[%s3907_s26 + $0x48] ss:$12 sps:$4 sm:$0xff]   ;;  %700 = vmatprep.subr.bf16.mxu1 %v3393_v39  ;;  %v3983_v45 = vld [vmem:[%s3907_s26 + $0x50] ss:$12 sps:$4 sm:$0xff]   ;;  %vm940_vm2 = vcmask 1046528  }
  0x83   : > { %3214 = vmatprep.subr.bf16.mxu0 %v3392_v38  ;;  %701 = vmatpush1.bf16.msra.mxu1 %v3395_v40  ;;  %v3398_v41 = vld [vmem:[%s3907_s26 + $0x7c] ss:$12 sps:$4 sm:$0xff]   ;;  %v3399_v42 = vld [vmem:[%s3907_s26 + $0x34] ss:$12 sps:$4 sm:$0xff]   ;;  %vm629_vm1 = vsmask.f32 7424 }
  0x84   : > { %s3325_s22 = smul.u32 48, %s3923_s15  ;;  %s3127_s19 = sshll.u32 %s3923_s15, 6  ;;  %702 = vmatprep.subr.bf16.mxu1 %v3399_v42  ;;  %v3407_v39 = vld [vmem:[%s3907_s26 + $0x38] ss:$12 sps:$4 sm:$0xff]   ;;  %vm1107_vm3 = vsmask.f32 6400 }
  0x85   : > { %s3945_s25 = scalar_lea.vmem %s4574_s7, %s3127_s19  ;;  %vm1282_vm4 = vcmask 1045504   ;;  %vm1449_vm5 = vsmask.f32 5376  ;;  %vm1622_vm6 = vcmask 1044480   ;;  %vm1789_vm7 = vsmask.f32 4352 }
  0x86   : > { %s3929_s18 = scalar_lea.vmem %s4567_s0, %s3325_s22  ;;  %3215 = vmatpush3.bf16.msra.mxu0 %v3392_v38  ;;  %v3406_v38 = vld [vmem:[%s3907_s26 + $0xb0] ss:$12 sps:$4 sm:$0xff]   ;;  %vm3676_vm8 = vmmov 0   ;;  %vm2334_vm9 = vcmask 523264   ;;  %vm2367_vm10 = vcmask 1040384   ;;  %s2914_s22 = sshll.u32 %s3903_s11, 1 }
  0x87   : > { %v497_v0 = vld [vmem:[%s3929_s18] sm:$0xff]  ;;  %v499_v1 = vld [vmem:[%s3929_s18 + $0x10] sm:$0xff]  ;;  %v498_v2 = vld [vmem:[%s3929_s18 + $0x8] sm:$0xff]  ;;  %996 = vmatprep.subr.bf16.mxu0 %v3398_v41  ;;  %703 = vmatpush1.bf16.msra.mxu1 %v3401_v43  ;;  %s3124_s19 = sshll.u32 %s3749_s13, 5  ;;  %s479_s24 = scalar_lea.vmem [#allocation8], %s2914_s22 }
  0x88   : > { %v504_v3 = vsel %vm503_vm0, %v497_v0, 0.0  ;;  %v510_v4 = vsel %vm503_vm0, %v499_v1, 0.0  ;;  %v500_v5 = vld [vmem:[%s3929_s18 + $0x18] sm:$0xff]  ;;  %v507_v6 = vsel %vm503_vm0, %v498_v2, 0.0  ;;  %v501_v7 = vld [vmem:[%s3929_s18 + $0x20] sm:$0xff]  ;;  %v502_v34 = vld [vmem:[%s3929_s18 + $0x28] sm:$0xff]  ;;  %3204 = vmatprep.subr.bf16.mxu1 %v3983_v45  ;;  %s495_s18 = scalar_lea.vmem %s4575_s8, %s3923_s15  ;;  %s4524_s4 = scalar_lea.hbm %s4576_s9, %s3124_s19 }
  0x89   : > { %505 = vadd.xlane.f32.xlu0 %v504_v3  ;;  %511 = vadd.xlane.f32.xlu1 %v510_v4  ;;  %v513_v8 = vsel %vm503_vm0, %v500_v5, 0.0  ;;  %v516_v9 = vsel %vm503_vm0, %v501_v7, 0.0  ;;  %v519_v36 = vsel %vm503_vm0, %v502_v34, 0.0  ;;  %v3995_v4 = vld [vmem:[%s4568_s1] ss:$0 sm:$0xff]  ;;  %s2752_s14 = sshll.u32 %s479_s24, 4  ;;  %s4526_s14 = int_to_ptr.vmem [resolvable:$true] %s2752_s14 }
  0x8a   : > { %s3595_s30 = scalar_lea.vmem %s4526_s14, 32  ;;  %p4631_p8 = scmp.ne.s32.totalorder %s4593_s20, 0 }
  0x8b   : > { %p3596_p7 = scmp.ne.s32.totalorder %s4526_s14, %s3595_s30  ;;  %s3677_s13 = smov [#allocation8]  }
  0x8c   : > { %s3599_s21 = sshll.u32 %s3677_s13, 4  ;;  %s3600_s21 = int_to_ptr.vmem [resolvable:$false] %s3599_s21 }
  0x8d   : > { %508 = vadd.xlane.f32.xlu0 %v507_v6  ;;  %514 = vadd.xlane.f32.xlu1 %v513_v8  ;;  %p3597_p10 = pnand %p3596_p7, %p4631_p8  ;;  %p3602_p3 = scmp.lt.s32.totalorder %s4526_s14, %s3600_s21 }
  0x8f   : > { %p3598_p1 = pneg %p3597_p10 }
  0x91   : > { %517 = vadd.xlane.f32.xlu0 %v516_v9 }
 0x112   : > { %v506_v10 = vpop.xlane.xlu0 %505  ;;  %v512_v11 = vpop.xlane.xlu1 %511 }
 0x113   : > { %v523_v12 = vmul.f32 0.03125, %v506_v10  ;;  %v525_v13 = vmul.f32 0.03125, %v512_v11  ;;  %v4003_v10 = vld [vmem:[%s4569_s2] ss:$0 sm:$0xff] }
 0x115   : > { %v3947_v14 = vsub.f32 %v497_v0, %v523_v12  ;;  %v3949_v15 = vsub.f32 %v499_v1, %v525_v13 }
 0x116   : > { %v509_v16 = vpop.xlane.xlu0 %508  ;;  %v515_v17 = vpop.xlane.xlu1 %514 }
 0x117   : > { %v524_v18 = vmul.f32 0.03125, %v509_v16  ;;  %v526_v19 = vmul.f32 0.03125, %v515_v17  ;;  %v535_v20 = vmul.f32 %v3947_v14, %v3947_v14  ;;  %v537_v21 = vmul.f32 %v3949_v15, %v3949_v15 }
 0x119   : > { %v3955_v22 = vsub.f32 %v498_v2, %v524_v18  ;;  %v3957_v23 = vsub.f32 %v500_v5, %v526_v19  ;;  %v541_v24 = vsel %vm503_vm0, %v535_v20, 0.0  ;;  %v547_v27 = vsel %vm503_vm0, %v537_v21, 0.0 }
 0x11a   : > { %542 = vadd.xlane.f32.xlu1 %v541_v24  ;;  %v518_v25 = vpop.xlane.xlu0 %517 }
 0x11b   : > { %v527_v26 = vmul.f32 0.03125, %v518_v25  ;;  %v536_v28 = vmul.f32 %v3955_v22, %v3955_v22  ;;  %v538_v29 = vmul.f32 %v3957_v23, %v3957_v23 }
 0x11d   : > { %v3965_v30 = vsub.f32 %v501_v7, %v527_v26  ;;  %v544_v31 = vsel %vm503_vm0, %v536_v28, 0.0  ;;  %v550_v32 = vsel %vm503_vm0, %v538_v29, 0.0  ;;  %v3404_v29 = vld [vmem:[%s3907_s26 + $0x64] ss:$12 sps:$4 sm:$0xff]  }
 0x11e   : > { %548 = vadd.xlane.f32.xlu1 %v547_v27  ;;  %545 = vadd.xlane.f32.xlu0 %v544_v31  ;;  %v3396_v27 = vld [vmem:[%s3907_s26 + $0x78] ss:$12 sps:$4 sm:$0xff]  }
 0x11f   : > { %v539_v33 = vmul.f32 %v3965_v30, %v3965_v30 }
 0x121   : > { %v553_v35 = vsel %vm503_vm0, %v539_v33, 0.0  ;;  %v3402_v33 = vld [vmem:[%s3907_s26 + $0x60] ss:$12 sps:$4 sm:$0xff]  }
 0x122   : > { %551 = vadd.xlane.f32.xlu0 %v550_v32  ;;  %554 = vadd.xlane.f32.xlu1 %v553_v35 }
 0x126   : > { %520 = vadd.xlane.f32.xlu0 %v519_v36 }
 0x1a3   : > { %v543_v46 = vpop.xlane.xlu1 %542 }
 0x1a4   : > { %v559_v47 = vmul.f32 0.03125, %v543_v46  ;;  %v3408_v46 = vld [vmem:[%s3907_s26 + $0x98] ss:$12 sps:$4 sm:$0xff]  }
 0x1a6   : > { %v565_v48 = vadd.f32 1e-12, %v559_v47 }
 0x1a7   : > { %v549_v49 = vpop.xlane.xlu1 %548  ;;  %v546_v50 = vpop.xlane.xlu0 %545 }
 0x1a8   : > { %3499 = vrsqrt.f32 %v565_v48  ;;  %v561_v51 = vmul.f32 0.03125, %v549_v49  ;;  %v560_v52 = vmul.f32 0.03125, %v546_v50  ;;  %v3411_v48 = vld [vmem:[%s3907_s26 + $0x1c] ss:$12 sps:$4 sm:$0xff]  }
 0x1aa   : > { %v567_v53 = vadd.f32 1e-12, %v561_v51  ;;  %v566_v54 = vadd.f32 1e-12, %v560_v52 }
 0x1ab   : > { %v555_v55 = vpop.xlane.xlu1 %554  ;;  %v552_v56 = vpop.xlane.xlu0 %551 }
 0x1ac   : > { %3501 = vrsqrt.f32 %v567_v53  ;;  %v563_v57 = vmul.f32 0.03125, %v555_v55  ;;  %v562_v58 = vmul.f32 0.03125, %v552_v56  ;;  %v3414_v55 = vld [vmem:[%s3907_s26 + $0xdc] ss:$12 sps:$4 sm:$0xff]  }
 0x1ad   : > { %3503 = vrsqrt.f32 %v566_v54 }
 0x1ae   : > { %v569_v59 = vadd.f32 1e-12, %v563_v57  ;;  %v568_v60 = vadd.f32 1e-12, %v562_v58 }
 0x1af   : > { %v521_v61 = vpop.xlane.xlu0 %520 }
 0x1b0   : > { %3505 = vrsqrt.f32 %v569_v59  ;;  %v528_v62 = vmul.f32 0.03125, %v521_v61 }
 0x1b1   : > { %3507 = vrsqrt.f32 %v568_v60 }
 0x1b2   : > { %v3986_v63 = vsub.f32 %v502_v34, %v528_v62 }
 0x1b4   : > { %v540_v0 = vmul.f32 %v3986_v63, %v3986_v63 }
 0x1b5   : > { %v3500_v1 = vpop.eup %3499 }
 0x1b6   : > { %v556_v2 = vsel %vm503_vm0, %v540_v0, 0.0  ;;  %v577_v3 = vmul.f32 %v3500_v1, %v3947_v14 }
 0x1b7   : > { %557 = vadd.xlane.f32.xlu1 %v556_v2 }
 0x1b8   : > { %v590_v8 = vmul.f32 %v3995_v4, %v577_v3 }
 0x1b9   : > { %v3502_v5 = vpop.eup %3501 }
 0x1ba   : > { %v3504_v6 = vpop.eup %3503  ;;  %v579_v7 = vmul.f32 %v3502_v5, %v3949_v15  ;;  %v603_v17 = vadd.f32 %v4003_v10, %v590_v8 }
 0x1bb   : > { %v578_v9 = vmul.f32 %v3504_v6, %v3955_v22 }
 0x1bc   : > { %v592_v11 = vmul.f32 %v3995_v4, %v579_v7 }
 0x1bd   : > { %v3506_v12 = vpop.eup %3505  ;;  %v591_v13 = vmul.f32 %v3995_v4, %v578_v9 }
 0x1be   : > { %v3508_v14 = vpop.eup %3507  ;;  %v605_v16 = vadd.f32 %v4003_v10, %v592_v11  ;;  %v581_v15 = vmul.f32 %v3506_v12, %v3965_v30  ;;  %v3409_v11 = vld [vmem:[%s3907_s26 + $0x18] ss:$12 sps:$4 sm:$0xff]  }
 0x1bf   : > { %v604_v18 = vadd.f32 %v4003_v10, %v591_v13  ;;  %v580_v19 = vmul.f32 %v3508_v14, %v3957_v23  ;;  %v3417_v13 = vld [vmem:[%s3907_s26 + $0x4] ss:$12 sps:$4 sm:$0xff]  }
 0x1c0   : > { %v594_v21 = vmul.f32 %v3995_v4, %v581_v15  ;;  %v3412_v14 = vld [vmem:[%s3907_s26 + $0xd8] ss:$12 sps:$4 sm:$0xff]  }
 0x1c1   : > { %v4012_v20 = vpack.c.bf16 %v604_v18, %v603_v17  ;;  %v593_v22 = vmul.f32 %v3995_v4, %v580_v19  ;;  %v4016_v24 = vpack.c.bf16 %v605_v16, %v604_v18  ;;  %v3420_v15 = vld [vmem:[%s3907_s26 + $0xc4] ss:$12 sps:$4 sm:$0xff]   ;;  %v3421_v18 = vld [vmem:[%s3907_s26 + $0x80] ss:$12 sps:$4 sm:$0xff]  }
 0x1c2   : > { %v607_v23 = vadd.f32 %v4003_v10, %v594_v21  ;;  %v3418_v19 = vld [vmem:[%s3907_s26 + $0xc0] ss:$12 sps:$4 sm:$0xff]  }
 0x1c3   : > { %v606_v25 = vadd.f32 %v4003_v10, %v593_v22  ;;  %3216 = vmatprep.mubr.msk.bf16.mxu0 %vm503_vm0, %v4012_v20  ;;  %v4022_v26 = vshll.u32 %v4012_v20, 16  ;;  %v4033_v31 = vshrl.u32 %v4012_v20, 16  ;;  %v941_v42 = vrot.slane %v4012_v20, 1  ;;  %v3422_v22 = vld [vmem:[%s3907_s26 + $0x110] ss:$12 sps:$4 sm:$0xff]  }
 0x1c4   : > { %v4040_v34 = vpack.c.bf16 %v607_v23, %v607_v23  ;;  %v2128_v58 = vshll.u32 %v4016_v24, 16  ;;  %v2126_v61 = vshrl.u32 %v4016_v24, 16 }
 0x1c5   : > { %v4026_v28 = vpack.c.bf16 %v606_v25, %v605_v16  ;;  %v635_v30 = vrot.slane %v4022_v26, 1  ;;  %v1108_v52 = vrot.slane %v4033_v31, 1  ;;  %v1109_v53 = vrot.slane %v4022_v26, 2  ;;  %v3415_v16 = vld [vmem:[%s3907_s26] ss:$12 sps:$4 sm:$0xff]  }
 0x1c6   : > { %v4055_v43 = vshll.u32 %v4040_v34, 16  ;;  %v4073_v54 = vshrl.u32 %v4040_v34, 16  ;;  %v944_v56 = vrot.slane %v4040_v34, 1  ;;  %v4077_v57 = vpack.c.bf16 %v607_v23, %v606_v25  ;;  %v3423_v25 = vld [vmem:[%s3907_s26 + $0x68] ss:$12 sps:$4 sm:$0xff]  }
 0x1c7   : > { %3217 = vmatmul.mubr.msk.bf16.vlgmr.msra.gmra.mxu0 %vm503_vm0, %v4026_v28  ;;  %v4036_v32 = vshll.u32 %v4026_v28, 16  ;;  %v636_v35 = vor.u32 %v635_v30, %v4033_v31  ;;  %v942_v37 = vrot.slane %v4026_v28, 1  ;;  %v4049_v41 = vshrl.u32 %v4026_v28, 16  ;;  %v3424_v23 = vld [vmem:[%s3907_s26 + $0xf8] ss:$12 sps:$4 sm:$0xff]  }
 0x1c8   : > { %997 = vmatpush1.bf16.msra.mxu0 %v3396_v27  ;;  %1016 = vmatprep.mubr.bf16.mxu0 %v3674_v44  ;;  %v2130_v62 = vrot.slane %v2128_v58, 1  ;;  %v2132_v0 = vshll.u32 %v4077_v57, 16  ;;  %v1110_v1 = vor.u32 %v1109_v53, %v1108_v52  ;;  %v1117_v2 = vrot.slane %v4073_v54, 1  ;;  %v3427_v30 = vld [vmem:[%s3907_s26 + $0xac] ss:$12 sps:$4 sm:$0xff]  }
 0x1c9   : > { %998 = vmatprep.subr.bf16.mxu0 %v3404_v29  ;;  %v640_v36 = vrot.slane %v4036_v32, 1  ;;  %v4060_v47 = vsel %vm940_vm2, %v941_v42, %v942_v37  ;;  %v1111_v50 = vrot.slane %v4049_v41, 1  ;;  %v1112_v51 = vrot.slane %v4036_v32, 2  ;;  %v3428_v52 = vld [vmem:[%s3907_s26 + $0x138] ss:$12 sps:$4 sm:$0xff]  }
 0x1ca   : > { %v4087_v3 = vsel %vm940_vm2, %v942_v37, %v944_v56  ;;  %v1118_v5 = vrot.slane %v4055_v43, 2  ;;  %v2131_v6 = vor.u32 %v2130_v62, %v2126_v61  ;;  %v4090_v7 = vrot.slane %v2132_v0, 1  ;;  %v3431_v53 = vld [vmem:[%s3907_s26 + $0x90] ss:$12 sps:$4 sm:$0xff]   ;;  %v3437_v58 = vld [vmem:[%s3907_s26 + $0xe0] ss:$12 sps:$4 sm:$0xff]  }
 0x1cb   : > { %v641_v40 = vsel %vm629_vm1, %v636_v35, %v640_v36  ;;  %v644_v49 = vor.u32 %v4049_v41, %v640_v36  ;;  %v1113_v60 = vor.u32 %v1112_v51, %v1111_v50  ;;  %v1284_v21 = vrot.slane %v4026_v28, 2  ;;  %v3438_v61 = vld [vmem:[%s3907_s26 + $0x170] ss:$12 sps:$4 sm:$0xff]   ;;  %v3439_v62 = vld [vmem:[%s3907_s26 + $0xc8] ss:$12 sps:$4 sm:$0xff]  }
 0x1cc   : > { %2934 = vmatmul.mubr.msk.bf16.vlgmr.msra.gmra.mxu1 %vm503_vm0, %v641_v40  ;;  %999 = vmatpush1.bf16.msra.mxu0 %v3402_v33  ;;  %v4101_v9 = vsel %vm629_vm1, %v2131_v6, %v4090_v7  ;;  %v1119_v12 = vor.u32 %v1118_v5, %v1117_v2  ;;  %v1283_v27 = vrot.slane %v4012_v20, 2  ;;  %v1453_v33 = vrot.slane %v4049_v41, 2 }
 0x1cd   : > { %730 = vmatprep.mubr.bf16.mxu1 %v3674_v44  ;;  %3205 = vmatpush3.bf16.msra.mxu1 %v3983_v45  ;;  %v648_v45 = vrot.slane %v4055_v43, 1  ;;  %v4095_v8 = vsel %vm1107_vm3, %v1110_v1, %v1113_v60  ;;  %v1454_v35 = vrot.slane %v4036_v32, 3  ;;  %v1450_v36 = vrot.slane %v4033_v31, 2  ;;  %v3440_v1 = vld [vmem:[%s3907_s26 + $0x158] ss:$12 sps:$4 sm:$0xff]  }
 0x1ce   : > { %3228 = vmatprep.subr.bf16.mxu0 %v3406_v38  ;;  %3206 = vmatprep.subr.bf16.mxu1 %v3407_v39  ;;  %v4111_v17 = vsel %vm1107_vm3, %v1113_v60, %v1119_v12  ;;  %v4127_v29 = vsel %vm1282_vm4, %v1283_v27, %v1284_v21  ;;  %v1451_v37 = vrot.slane %v4022_v26, 3  ;;  %v1624_v60 = vrot.slane %v4026_v28, 3  ;;  %v3457_v27 = vld [vmem:[%s3907_s26 + $0x16c] ss:$12 sps:$4 sm:$0xff]  }
 0x1cf   : > { %2962 = vmatmul.mubr.msk.bf16.vlgmr.msra.gmra.mxu0 %vm503_vm0, %v4060_v47  ;;  %v649_v59 = vsel %vm629_vm1, %v644_v49, %v648_v45  ;;  %v1458_v49 = vrot.slane %v4055_v43, 3  ;;  %v3433_v45 = vld [vmem:[%s3907_s26 + $0x94] ss:$12 sps:$4 sm:$0xff]   ;;  %v1623_v0 = vrot.slane %v4012_v20, 3  ;;  %v1794_v5 = vrot.slane %v4036_v32, 4 }
 0x1d0   : > { %1026 = vmatprep.mubr.bf16.mxu0 %v3674_v44  ;;  %3229 = vmatpush3.bf16.msra.mxu0 %v3406_v38  ;;  %v3430_v38 = vld [vmem:[%s3907_s26 + $0x13c] ss:$12 sps:$4 sm:$0xff]   ;;  %v1452_v42 = vor.u32 %v1451_v37, %v1450_v36  ;;  %v1791_v6 = vrot.slane %v4022_v26, 4  ;;  %v1797_v32 = vrot.slane %v4073_v54, 3  ;;  %v3465_v36 = vld [vmem:[%s3907_s26 + $0x1cc] ss:$12 sps:$4 sm:$0xff]  }
 0x1d1   : > { %3207 = vmatpush3.bf16.msra.mxu1 %v3407_v39  ;;  %3230 = vmatprep.subr.bf16.mxu0 %v3408_v46  ;;  %v1286_v39 = vrot.slane %v4040_v34, 2  ;;  %v4180_v2 = vsel %vm1622_vm6, %v1623_v0, %v1624_v60  ;;  %v3463_v37 = vld [vmem:[%s3907_s26 + $0x1c8] ss:$12 sps:$4 sm:$0xff]  }
 0x1d2   : > { %838 = vmatprep.subr.bf16.mxu1 %v3411_v48  ;;  %v1457_v48 = vrot.slane %v4073_v54, 2  ;;  %v3447_v54 = vld [vmem:[%s3907_s26 + $0xf0] ss:$12 sps:$4 sm:$0xff]  }
 0x1d4   : > { %2935 = vmatmul.mubr.msk.bf16.gmra.mxu1 %vm503_vm0, %v649_v59  ;;  %3231 = vmatpush3.bf16.msra.mxu0 %v3408_v46  ;;  %v4144_v46 = vsel %vm1282_vm4, %v1284_v21, %v1286_v39  ;;  %v1459_v51 = vor.u32 %v1458_v49, %v1457_v48  ;;  %v3454_v21 = vld [vmem:[%s3907_s26 + $0x128] ss:$12 sps:$4 sm:$0xff]   ;;  %v3466_v39 = vld [vmem:[%s3907_s26 + $0x1b0] ss:$12 sps:$4 sm:$0xff]  }
 0x1d5   : > { %3208 = vmatprep.mubr.msk.bf16.mxu1 %vm503_vm0, %v641_v40  ;;  %1338 = vmatprep.subr.bf16.mxu0 %v3414_v55  ;;  %v1455_v40 = vor.u32 %v1454_v35, %v1453_v33  ;;  %v3436_v55 = vld [vmem:[%s3907_s26 + $0x124] ss:$12 sps:$4 sm:$0xff]   ;;  %v3461_v33 = vld [vmem:[%s3907_s26 + $0x1a0] ss:$12 sps:$4 sm:$0xff]   ;;  %v3462_v35 = vld [vmem:[%s3907_s26 + $0x188] ss:$12 sps:$4 sm:$0xff]  }
 0x1d7   : > { %2963 = vmatmul.mubr.msk.bf16.gmra.mxu0 %vm503_vm0, %v4087_v3  ;;  %v4151_v50 = vsel %vm1449_vm5, %v1452_v42, %v1455_v40  ;;  %v4164_v56 = vsel %vm1449_vm5, %v1455_v40, %v1459_v51  ;;  %v2136_v51 = vshrl.u32 %v4077_v57, 16 }
 0x1d8   : > { %3232 = vmatprep.mubr.msk.bf16.mxu0 %vm503_vm0, %v4095_v8 }
 0x1dc   : > { %3209 = vmatmul.mubr.msk.bf16.vlgmr.msra.gmra.mxu1 %vm503_vm0, %v649_v59  ;;  %v3434_v59 = vld [vmem:[%s3907_s26 + $0x120] ss:$12 sps:$4 sm:$0xff]  }
 0x1dd   : > { %839 = vmatpush1.bf16.msra.mxu1 %v3409_v11  ;;  %858 = vmatprep.mubr.bf16.mxu1 %v3674_v44  ;;  %v1626_v11 = vrot.slane %v4040_v34, 3  ;;  %v1798_v34 = vrot.slane %v4055_v43, 4  ;;  %v3452_v43 = vld [vmem:[%s3907_s26 + $0x184] ss:$12 sps:$4 sm:$0xff]  }
 0x1de   : > { %840 = vmatprep.subr.bf16.mxu1 %v3417_v13  ;;  %v3441_v13 = vld [vmem:[%s3907_s26 + $0x108] ss:$12 sps:$4 sm:$0xff]  }
 0x1df   : > { %3233 = vmatmul.mubr.msk.bf16.vlgmr.msra.gmra.mxu0 %vm503_vm0, %v4111_v17 }
 0x1e0   : > { %1339 = vmatpush1.bf16.msra.mxu0 %v3412_v14  ;;  %1358 = vmatprep.mubr.bf16.mxu0 %v3674_v44  ;;  %v1799_v14 = vor.u32 %v1798_v34, %v1797_v32 }
 0x1e1   : > { %841 = vmatpush1.bf16.msra.mxu1 %v3415_v16  ;;  %1340 = vmatprep.subr.bf16.mxu0 %v3420_v15  ;;  %v3449_v16 = vld [vmem:[%s3907_s26 + $0xf4] ss:$12 sps:$4 sm:$0xff]   ;;  %v3444_v15 = vld [vmem:[%s3907_s26 + $0x198] ss:$12 sps:$4 sm:$0xff]  }
 0x1e2   : > { %3220 = vmatprep.subr.bf16.mxu1 %v3421_v18 }
 0x1e4   : > { %2944 = vmatmul.mubr.msk.bf16.vlgmr.msra.gmra.mxu1 %vm503_vm0, %v4012_v20  ;;  %1341 = vmatpush1.bf16.msra.mxu0 %v3418_v19  ;;  %v1790_v20 = vrot.slane %v4033_v31, 3  ;;  %v1627_v31 = vsel %vm1622_vm6, %v1624_v60, %v1626_v11  ;;  %v3450_v19 = vld [vmem:[%s3907_s26 + $0x180] ss:$12 sps:$4 sm:$0xff]  }
 0x1e5   : > { %868 = vmatprep.mubr.bf16.mxu1 %v3674_v44  ;;  %3221 = vmatpush3.bf16.msra.mxu1 %v3421_v18  ;;  %v3453_v18 = vld [vmem:[%s3907_s26 + $0x140] ss:$12 sps:$4 sm:$0xff]  }
 0x1e6   : > { %3244 = vmatprep.subr.bf16.mxu0 %v3422_v22  ;;  %3222 = vmatprep.subr.bf16.mxu1 %v3423_v25  ;;  %v1792_v26 = vor.u32 %v1791_v6, %v1790_v20 }
 0x1e7   : > { %2998 = vmatmul.mubr.msk.bf16.vlgmr.msra.gmra.mxu0 %vm503_vm0, %v4127_v29 }
 0x1e8   : > { %1368 = vmatprep.mubr.bf16.mxu0 %v3674_v44  ;;  %3245 = vmatpush3.bf16.msra.mxu0 %v3422_v22  ;;  %v3469_v22 = vld [vmem:[%s3907_s26 + $0x1d0] ss:$12 sps:$4 sm:$0xff]  }
 0x1e9   : > { %3223 = vmatpush3.bf16.msra.mxu1 %v3423_v25  ;;  %3246 = vmatprep.subr.bf16.mxu0 %v3424_v23  ;;  %v3470_v25 = vld [vmem:[%s3907_s26 + $0x1b8] ss:$12 sps:$4 sm:$0xff]  }
 0x1ea   : > { %1171 = vmatprep.subr.bf16.mxu1 %v3427_v30  ;;  %v3458_v30 = vld [vmem:[%s3907_s26 + $0x150] ss:$12 sps:$4 sm:$0xff]  }
 0x1ec   : > { %2945 = vmatmul.mubr.msk.bf16.gmra.mxu1 %vm503_vm0, %v4026_v28  ;;  %3247 = vmatpush3.bf16.msra.mxu0 %v3424_v23  ;;  %v3443_v28 = vld [vmem:[%s3907_s26 + $0x10c] ss:$12 sps:$4 sm:$0xff]   ;;  %v3455_v23 = vld [vmem:[%s3907_s26 + $0x168] ss:$12 sps:$4 sm:$0xff]  }
 0x1ed   : > { %3224 = vmatprep.mubr.msk.bf16.mxu1 %vm503_vm0, %v4060_v47  ;;  %1678 = vmatprep.subr.bf16.mxu0 %v3430_v38  ;;  %v3425_v47 = vld [vmem:[%s3907_s26 + $0xa8] ss:$12 sps:$4 sm:$0xff]  }
 0x1ee   : > { %v3468_v38 = vld [vmem:[%s3907_s26 + $0x1b4] ss:$12 sps:$4 sm:$0xff]  }
 0x1ef   : > { %2999 = vmatmul.mubr.msk.bf16.gmra.mxu0 %vm503_vm0, %v4144_v46 }
 0x1f0   : > { %3248 = vmatprep.mubr.msk.bf16.mxu0 %vm503_vm0, %v4151_v50 }
 0x1f4   : > { %3225 = vmatmul.mubr.msk.bf16.vlgmr.msra.gmra.mxu1 %vm503_vm0, %v4087_v3  ;;  %v1793_v3 = vrot.slane %v4049_v41, 3 }
 0x1f5   : > { %1172 = vmatpush1.bf16.msra.mxu1 %v3425_v47  ;;  %1191 = vmatprep.mubr.bf16.mxu1 %v3674_v44 }
 0x1f6   : > { %1173 = vmatprep.subr.bf16.mxu1 %v3433_v45  ;;  %v1795_v12 = vor.u32 %v1794_v5, %v1793_v3 }
 0x1f7   : > { %3249 = vmatmul.mubr.msk.bf16.vlgmr.msra.gmra.mxu0 %vm503_vm0, %v4164_v56 }
 0x1f8   : > { %1679 = vmatpush1.bf16.msra.mxu0 %v3428_v52  ;;  %1698 = vmatprep.mubr.bf16.mxu0 %v3674_v44  ;;  %v1796_v41 = vsel %vm1789_vm7, %v1792_v26, %v1795_v12  ;;  %v2138_v52 = vor.u32 %v2136_v51, %v4090_v7 }
 0x1f9   : > { %1174 = vmatpush1.bf16.msra.mxu1 %v3431_v53  ;;  %1680 = vmatprep.subr.bf16.mxu0 %v3436_v55 }
 0x1fa   : > { %3236 = vmatprep.subr.bf16.mxu1 %v3437_v58 }
 0x1fc   : > { %2980 = vmatmul.mubr.msk.bf16.vlgmr.msra.gmra.mxu1 %vm503_vm0, %v4095_v8  ;;  %1681 = vmatpush1.bf16.msra.mxu0 %v3434_v59  ;;  %v3446_v8 = vld [vmem:[%s3907_s26 + $0x19c] ss:$12 sps:$4 sm:$0xff]  }
 0x1fd   : > { %1201 = vmatprep.mubr.bf16.mxu1 %v3674_v44  ;;  %3237 = vmatpush3.bf16.msra.mxu1 %v3437_v58 }
 0x1fe   : > { %3260 = vmatprep.subr.bf16.mxu0 %v3438_v61  ;;  %3238 = vmatprep.subr.bf16.mxu1 %v3439_v62 }
 0x1ff   : > { %3034 = vmatmul.mubr.msk.bf16.vlgmr.msra.gmra.mxu0 %vm503_vm0, %v4180_v2 }
 0x200   : > { %1708 = vmatprep.mubr.bf16.mxu0 %v3674_v44  ;;  %3261 = vmatpush3.bf16.msra.mxu0 %v3438_v61 }
 0x201   : > { %3239 = vmatpush3.bf16.msra.mxu1 %v3439_v62  ;;  %3262 = vmatprep.subr.bf16.mxu0 %v3440_v1 }
 0x202   : > { %1511 = vmatprep.subr.bf16.mxu1 %v3443_v28 }
 0x204   : > { %2981 = vmatmul.mubr.msk.bf16.gmra.mxu1 %vm503_vm0, %v4111_v17  ;;  %3263 = vmatpush3.bf16.msra.mxu0 %v3440_v1  ;;  %v1800_v17 = vsel %vm1789_vm7, %v1795_v12, %v1799_v14 }
 0x205   : > { %3240 = vmatprep.mubr.msk.bf16.mxu1 %vm503_vm0, %v4127_v29  ;;  %2014 = vmatprep.subr.bf16.mxu0 %v3446_v8  ;;  %v3460_v29 = vld [vmem:[%s3907_s26 + $0x154] ss:$12 sps:$4 sm:$0xff]   ;;  %s3324_s26 = smul.u32 160, %s3903_s11 }
 0x207   : > { %3035 = vmatmul.mubr.msk.bf16.gmra.mxu0 %vm503_vm0, %v1627_v31  ;;  %s4264_s23 = scalar_lea.vmem [#allocation7], %s3324_s26  ;;  %s3601_s26 = scalar_lea.vmem %s3600_s21, 64 }
 0x208   : > { %3264 = vmatprep.mubr.msk.bf16.mxu0 %vm503_vm0, %v1796_v41  ;;  %v3471_v6 = vld [vmem:[%s4264_s23 + $0x78] sm:$0xff]   ;;  %p3603_p9 = scmp.lt.s32.totalorder %s3601_s26, %s3595_s30 }
 0x209   : > { %v3472_v12 = vld [vmem:[%s4264_s23 + $0x38] sm:$0xff]  }
 0x20a   : > { %p3604_p12 = por %p3603_p9, %p3602_p3 }
 0x20c   : > { %3241 = vmatmul.mubr.msk.bf16.vlgmr.msra.gmra.mxu1 %vm503_vm0, %v4144_v46  ;;  %p3605_p6 = pnand %p3604_p12, %p3598_p1 }
 0x20d   : > { %1512 = vmatpush1.bf16.msra.mxu1 %v3441_v13  ;;  %1531 = vmatprep.mubr.bf16.mxu1 %v3674_v44 }
 0x20e   : > { %1513 = vmatprep.subr.bf16.mxu1 %v3449_v16 }
 0x20f   : > { %3265 = vmatmul.mubr.msk.bf16.vlgmr.msra.gmra.mxu0 %vm503_vm0, %v1800_v17 }
 0x210   : > { %2015 = vmatpush1.bf16.msra.mxu0 %v3444_v15  ;;  %2034 = vmatprep.mubr.bf16.mxu0 %v3674_v44 }
 0x211   : > { %1514 = vmatpush1.bf16.msra.mxu1 %v3447_v54  ;;  %2016 = vmatprep.subr.bf16.mxu0 %v3452_v43 }
 0x212   : > { %3252 = vmatprep.subr.bf16.mxu1 %v3453_v18 }
 0x214   : > { %3016 = vmatmul.mubr.msk.bf16.vlgmr.msra.gmra.mxu1 %vm503_vm0, %v4151_v50  ;;  %2017 = vmatpush1.bf16.msra.mxu0 %v3450_v19 }
 0x215   : > { %1541 = vmatprep.mubr.bf16.mxu1 %v3674_v44  ;;  %3253 = vmatpush3.bf16.msra.mxu1 %v3453_v18  ;;  %v3473_v18 = vld [vmem:[%s4264_s23 + $0x70] sm:$0xff]  }
 0x216   : > { %3254 = vmatprep.subr.bf16.mxu1 %v3454_v21  ;;  %3276 = vmatprep.subr.bf16.mxu0 %v3469_v22 }
 0x217   : > { %3070 = vmatmul.mubr.msk.bf16.vlgmr.msra.gmra.mxu0 %vm503_vm0, %v4016_v24 }
 0x218   : > { %2044 = vmatprep.mubr.bf16.mxu0 %v3674_v44  ;;  %3277 = vmatpush3.bf16.msra.mxu0 %v3469_v22 }
 0x219   : > { %3255 = vmatpush3.bf16.msra.mxu1 %v3454_v21  ;;  %3278 = vmatprep.subr.bf16.mxu0 %v3470_v25 }
 0x21a   : > { %1851 = vmatprep.subr.bf16.mxu1 %v3457_v27  ;;  %v3474_v27 = vld [vmem:[%s4264_s23 + $0x30] sm:$0xff]  }
 0x21c   : > { %3017 = vmatmul.mubr.msk.bf16.gmra.mxu1 %vm503_vm0, %v4164_v56  ;;  %3279 = vmatpush3.bf16.msra.mxu0 %v3470_v25 }
 0x21d   : > { %3256 = vmatprep.mubr.msk.bf16.mxu1 %vm503_vm0, %v4180_v2 }
 0x21f   : > { %3071 = vmatmul.mubr.msk.bf16.gmra.mxu0 %vm503_vm0, %v4077_v57 }
 0x220   : > { %3280 = vmatprep.mubr.msk.bf16.mxu0 %vm503_vm0, %v4101_v9 }
 0x224   : > { %3257 = vmatmul.mubr.msk.bf16.vlgmr.msra.gmra.mxu1 %vm503_vm0, %v1627_v31 }
 0x225   : > { %1852 = vmatpush1.bf16.msra.mxu1 %v3455_v23  ;;  %1871 = vmatprep.mubr.bf16.mxu1 %v3674_v44 }
 0x226   : > { %1853 = vmatprep.subr.bf16.mxu1 %v3460_v29 }
 0x229   : > { %1854 = vmatpush1.bf16.msra.mxu1 %v3458_v30 }
 0x22a   : > { %3268 = vmatprep.subr.bf16.mxu1 %v3461_v33 }
 0x22c   : > { %3052 = vmatmul.mubr.msk.bf16.vlgmr.msra.gmra.mxu1 %vm503_vm0, %v1796_v41 }
 0x22d   : > { %1881 = vmatprep.mubr.bf16.mxu1 %v3674_v44  ;;  %3269 = vmatpush3.bf16.msra.mxu1 %v3461_v33 }
 0x22e   : > { %3270 = vmatprep.subr.bf16.mxu1 %v3462_v35 }
 0x231   : > { %3271 = vmatpush3.bf16.msra.mxu1 %v3462_v35 }
 0x232   : > { %2194 = vmatprep.subr.bf16.mxu1 %v3465_v36 }
 0x234   : > { %3053 = vmatmul.mubr.msk.bf16.gmra.mxu1 %vm503_vm0, %v1800_v17 }
 0x235   : > { %3272 = vmatprep.mubr.msk.bf16.mxu1 %vm503_vm0, %v4016_v24 }
 0x23c   : > { %3273 = vmatmul.mubr.msk.bf16.vlgmr.msra.gmra.mxu1 %vm503_vm0, %v4077_v57 }
 0x23d   : > { %2195 = vmatpush1.bf16.msra.mxu1 %v3463_v37  ;;  %2214 = vmatprep.mubr.bf16.mxu1 %v3674_v44 }
 0x23e   : > { %2196 = vmatprep.subr.bf16.mxu1 %v3468_v38 }
 0x240   : > { %v558_v40 = vpop.xlane.xlu1 %557 }
 0x241   : > { %2197 = vmatpush1.bf16.msra.mxu1 %v3466_v39  ;;  %v564_v42 = vmul.f32 0.03125, %v558_v40 }
 0x242   : > { %3168 = vmatprep.subr.bf16.mxu1 %v3471_v6  ;;  %v3480_v6 = vld [vmem:[%s4264_s23 + $0x18] sm:$0xff]  }
 0x243   : > { %v570_v46 = vadd.f32 1e-12, %v564_v42 }
 0x244   : > { %3088 = vmatmul.mubr.msk.bf16.vlgmr.msra.gmra.mxu1 %vm503_vm0, %v4101_v9 }
 0x245   : > { %3509 = vrsqrt.f32 %v570_v46  ;;  %2224 = vmatprep.mubr.bf16.mxu1 %v3674_v44  ;;  %3169 = vmatpush3.bf16.msra.mxu1 %v3472_v12  ;;  %v3484_v12 = vld [vmem:[%s4264_s23 + $0x90] sm:$0xff]  }
 0x246   : > { %3170 = vmatprep.subr.bf16.mxu1 %v3473_v18 }
 0x249   : > { %3171 = vmatpush3.bf16.msra.mxu1 %v3474_v27  ;;  %v3488_v27 = vld [vmem:[%s4264_s23 + $0x40] sm:$0xff]  }
 0x252   : > { %v3510_v24 = vpop.eup %3509 }
 0x253   : > { %v582_v48 = vmul.f32 %v3510_v24, %v3986_v63 }
 0x255   : > { %v595_v49 = vmul.f32 %v3995_v4, %v582_v48 }
 0x257   : > { %v608_v50 = vadd.f32 %v4003_v10, %v595_v49 }
 0x259   : > { %v2116_v47 = vpack.c.bf16 %v608_v50, %v608_v50 }
 0x25b   : > { %v2140_v45 = vshll.u32 %v2116_v47, 16 }
 0x25d   : > { %v2142_v53 = vrot.slane %v2140_v45, 1 }
 0x25f   : > { %v2143_v55 = vsel %vm629_vm1, %v2138_v52, %v2142_v53 }
 0x260   : > { %3089 = vmatmul.mubr.msk.bf16.gmra.mxu1 %vm503_vm0, %v2143_v55  ;;  %3281 = vmatmul.mubr.msk.bf16.vlgmr.msra.gmra.mxu0 %vm503_vm0, %v2143_v55 }
 0x287   : > { %v3218_v44 = vpop.f32.mrf.mxu0 }
 0x289   : > { %v913_v9 = vpop.f32.mrf.mxu0 }
 0x28b   : > { %v3219_v63 = vpop.f32.mrf.mxu0 }
 0x28c   : > { %v722_v4 = vpop.f32.mrf.mxu1 }
 0x28d   : > { %v916_v56 = vpop.f32.mrf.mxu0 }
 0x28e   : > { %v724_v10 = vpop.f32.mrf.mxu1 }
 0x28f   : > { %v1018_v58 = vpop.f32.mrf.mxu0 }
 0x290   : > { %v726_v59 = vpop.f32.mrf.mxu1 }
 0x291   : > { %v1020_v57 = vpop.f32.mrf.mxu0 }
 0x292   : > { %v728_v60 = vpop.f32.mrf.mxu1 }
 0x293   : > { %v1022_v61 = vpop.f32.mrf.mxu0 }
 0x294   : > { %v732_v7 = vpop.f32.mrf.mxu1 }
 0x295   : > { %v1024_v62 = vpop.f32.mrf.mxu0 }
 0x296   : > { %v734_v0 = vpop.f32.mrf.mxu1 }
 0x297   : > { %v1028_v1 = vpop.f32.mrf.mxu0 }
 0x298   : > { %v736_v2 = vpop.f32.mrf.mxu1 }
 0x299   : > { %v1030_v28 = vpop.f32.mrf.mxu0 }
 0x29a   : > { %v738_v3 = vpop.f32.mrf.mxu1 }
 0x29b   : > { %v1032_v5 = vpop.f32.mrf.mxu0 }
 0x29c   : > { %v3210_v20 = vpop.f32.mrf.mxu1 }
 0x29d   : > { %v922_v8 = vadd.f32 %v3218_v44, %v3210_v20  ;;  %v1034_v11 = vpop.f32.mrf.mxu0 }
 0x29e   : > { %v775_v26 = vpop.f32.mrf.mxu1 }
 0x29f   : > { %v914_v31 = vadd.f32 %v913_v9, %v775_v26  ;;  %v3234_v32 = vpop.f32.mrf.mxu0  ;;  %v3475_v9 = vld [vmem:[%s4264_s23 + $0x68] sm:$0xff]  }
 0x2a0   : > { %v3211_v34 = vpop.f32.mrf.mxu1  ;;  %3172 = vmatprep.subr.bf16.mxu1 %v3475_v9 }
 0x2a1   : > { %v925_v41 = vadd.f32 %v3219_v63, %v3211_v34  ;;  %v1246_v13 = vpop.f32.mrf.mxu0 }
 0x2a2   : > { %v778_v14 = vpop.f32.mrf.mxu1 }
 0x2a3   : > { %v917_v16 = vadd.f32 %v916_v56, %v778_v14  ;;  %v4268_v15 = vpop.f32.mrf.mxu0  ;;  %v3476_v56 = vld [vmem:[%s4264_s23 + $0x28] sm:$0xff]  }
 0x2a4   : > { %v860_v54 = vpop.f32.mrf.mxu1  ;;  %3173 = vmatpush3.bf16.msra.mxu1 %v3476_v56  ;;  %v3485_v14 = vld [vmem:[%s4264_s23 + $0x48] sm:$0xff]  }
 0x2a5   : > { %v861_v43 = vadd.f32 %v860_v54, %v722_v4  ;;  %v4270_v17 = vpop.f32.mrf.mxu0 }
 0x2a6   : > { %v862_v19 = vpop.f32.mrf.mxu1 }
 0x2a7   : > { %v863_v21 = vadd.f32 %v862_v19, %v724_v10  ;;  %v4273_v22 = vpop.f32.mrf.mxu0  ;;  %v1086_v25 = vadd.f32 %v1018_v58, %v861_v43 }
 0x2a8   : > { %v864_v23 = vpop.f32.mrf.mxu1 }
 0x2a9   : > { %v865_v29 = vadd.f32 %v864_v23, %v726_v59  ;;  %v4276_v30 = vpop.f32.mrf.mxu0  ;;  %v1087_v33 = vadd.f32 %v1020_v57, %v863_v21  ;;  %v3486_v21 = vld [vmem:[%s4264_s23 + $0x8] sm:$0xff]   ;;  %v3490_v23 = vld [vmem:[%s4264_s23 + $0x80] sm:$0xff]  }
 0x2aa   : > { %v866_v35 = vpop.f32.mrf.mxu1 }
 0x2ab   : > { %v867_v36 = vadd.f32 %v866_v35, %v728_v60  ;;  %v4278_v37 = vpop.f32.mrf.mxu0  ;;  %v4280_v38 = vadd.f32 %v1022_v61, %v865_v29  ;;  %v3477_v61 = vld [vmem:[%s4264_s23 + $0x60] sm:$0xff]  }
 0x2ac   : > { %v870_v39 = vpop.f32.mrf.mxu1  ;;  %3174 = vmatprep.subr.bf16.mxu1 %v3477_v61 }
 0x2ad   : > { %v871_v40 = vadd.f32 %v870_v39, %v732_v7  ;;  %v4282_v42 = vpop.f32.mrf.mxu0  ;;  %v4284_v46 = vadd.f32 %v1024_v62, %v867_v36 }
 0x2ae   : > { %v872_v24 = vpop.f32.mrf.mxu1 }
 0x2af   : > { %v873_v48 = vadd.f32 %v872_v24, %v734_v0  ;;  %v4286_v49 = vpop.f32.mrf.mxu0  ;;  %v4288_v50 = vadd.f32 %v1028_v1, %v871_v40  ;;  %v3478_v0 = vld [vmem:[%s4264_s23 + $0x20] sm:$0xff]   ;;  %v3479_v1 = vld [vmem:[%s4264_s23 + $0x58] sm:$0xff]  }
 0x2b0   : > { %v874_v47 = vpop.f32.mrf.mxu1  ;;  %3175 = vmatpush3.bf16.msra.mxu1 %v3478_v0 }
 0x2b1   : > { %v875_v51 = vadd.f32 %v874_v47, %v736_v2  ;;  %v4290_v45 = vpop.f32.mrf.mxu0  ;;  %v4292_v52 = vadd.f32 %v1030_v28, %v873_v48  ;;  %3176 = vmatprep.subr.bf16.mxu1 %v3479_v1 }
 0x2b2   : > { %v876_v53 = vpop.f32.mrf.mxu1 }
 0x2b3   : > { %v877_v55 = vadd.f32 %v876_v53, %v738_v3  ;;  %v4294_v44 = vadd.f32 %v1032_v5, %v875_v51  ;;  %v4297_v63 = vpop.f32.mrf.mxu0  ;;  %v4584_v3 = vmov 0.0   ;;  %v3481_v5 = vld [vmem:[%s4264_s23 + $0x98] sm:$0xff]  }
 0x2b4   : > { %v3226_v4 = vpop.f32.mrf.mxu1  ;;  %3284 = vmatprep.subr.bf16.mxu0 %v4584_v3  ;;  %3292 = vmatprep.mubr.msk.bf16.mxu0 %vm3676_vm8, %v4584_v3 }
 0x2b5   : > { %v1094_v10 = vadd.f32 %v3226_v4, %v922_v8  ;;  %v4300_v58 = vadd.f32 %v1034_v11, %v877_v55  ;;  %v4305_v7 = vpop.f32.mrf.mxu0  ;;  %3285 = vmatpush3.bf16.msra.mxu0 %v3481_v5  ;;  %v3482_v11 = vld [vmem:[%s4264_s23 + $0x50] sm:$0xff]   ;;  %3177 = vmatpush3.bf16.msra.mxu1 %v3480_v6 }
 0x2b6   : > { %v1071_v59 = vpop.f32.mrf.mxu1  ;;  %3286 = vmatprep.subr.bf16.mxu0 %v4584_v3  ;;  %3178 = vmatprep.subr.bf16.mxu1 %v3482_v11 }
 0x2b7   : > { %v1088_v57 = vadd.f32 %v1071_v59, %v914_v31  ;;  %v4302_v60 = vadd.f32 %v3234_v32, %v1094_v10  ;;  %v4320_v26 = vpop.f32.mrf.mxu0 }
 0x2b8   : > { %v3227_v62 = vpop.f32.mrf.mxu1 }
 0x2b9   : > { %v4309_v2 = vadd.f32 %v3227_v62, %v925_v41  ;;  %v4311_v28 = vadd.f32 %v1246_v13, %v1088_v57  ;;  %v3483_v41 = vld [vmem:[%s4264_s23 + $0x10] sm:$0xff]   ;;  %3287 = vmatpush3.bf16.msra.mxu0 %v3484_v12  ;;  %v4332_v54 = vpop.f32.mrf.mxu0 }
 0x2ba   : > { %v1074_v20 = vpop.f32.mrf.mxu1  ;;  %3288 = vmatprep.subr.bf16.mxu0 %v4584_v3  ;;  %3179 = vmatpush3.bf16.msra.mxu1 %v3483_v41 }
 0x2bb   : > { %v4316_v8 = vadd.f32 %v1074_v20, %v917_v16  ;;  %v3487_v16 = vld [vmem:[%s4264_s23 + $0x88] sm:$0xff]   ;;  %3180 = vmatprep.subr.bf16.mxu1 %v3485_v14  ;;  %v4344_v29 = vpop.f32.mrf.mxu0 }
 0x2bc   : > { %v1193_v31 = vpop.f32.mrf.mxu1 }
 0x2bd   : > { %v4323_v32 = vadd.f32 %v1193_v31, %v1086_v25  ;;  %3289 = vmatpush3.bf16.msra.mxu0 %v3487_v16  ;;  %v4354_v40 = vpop.f32.mrf.mxu0 }
 0x2be   : > { %v1195_v34 = vpop.f32.mrf.mxu1  ;;  %3290 = vmatprep.subr.bf16.mxu0 %v4584_v3  ;;  %3181 = vmatpush3.bf16.msra.mxu1 %v3486_v21 }
 0x2bf   : > { %v4328_v13 = vadd.f32 %v1195_v34, %v1087_v33  ;;  %3182 = vmatprep.subr.bf16.mxu1 %v3488_v27  ;;  %v1700_v48 = vpop.f32.mrf.mxu0 }
 0x2c0   : > { %v1197_v43 = vpop.f32.mrf.mxu1 }
 0x2c1   : > { %v4336_v18 = vadd.f32 %v1197_v43, %v4280_v38  ;;  %v3489_v38 = vld [vmem:[%s4264_s23] sm:$0xff]   ;;  %3291 = vmatpush3.bf16.msra.mxu0 %v3490_v23  ;;  %v1702_v51 = vpop.f32.mrf.mxu0 }
 0x2c2   : > { %v1199_v19 = vpop.f32.mrf.mxu1  ;;  %3296 = vmatprep.subr.bf16.mxu0 %v4584_v3  ;;  %3183 = vmatpush3.bf16.msra.mxu1 %v3489_v38  ;;  %v1428_v3 = vadd.f32 %v4273_v22, %v4323_v32 }
 0x2c3   : > { %v4340_v25 = vadd.f32 %v1199_v19, %v4284_v46  ;;  %v1704_v55 = vpop.f32.mrf.mxu0 }
 0x2c4   : > { %v1203_v33 = vpop.f32.mrf.mxu1 }
 0x2c5   : > { %v4348_v35 = vadd.f32 %v1203_v33, %v4288_v50  ;;  %v1706_v56 = vpop.f32.mrf.mxu0 }
 0x2c6   : > { %v1205_v36 = vpop.f32.mrf.mxu1 }
 0x2c7   : > { %v4352_v39 = vadd.f32 %v1205_v36, %v4292_v52  ;;  %v4369_v57 = vpop.f32.mrf.mxu0 }
 0x2c8   : > { %v4356_v46 = vpop.f32.mrf.mxu1 }
 0x2c9   : > { %v4375_v0 = vpop.f32.mrf.mxu0 }
 0x2ca   : > { %v4359_v24 = vpop.f32.mrf.mxu1 }
 0x2cb   : > { %v4381_v20 = vpop.f32.mrf.mxu0 }
 0x2cc   : > { %v4361_v50 = vpop.f32.mrf.mxu1  ;;  %4604 = vst [vmem:[#allocation17_spill] sm:$0xff] %v4381_v20 }
 0x2cd   : > { %v4387_v12 = vpop.f32.mrf.mxu0 }
 0x2ce   : > { %v4363_v47 = vpop.f32.mrf.mxu1  ;;  %4605 = vst [vmem:[#allocation18_spill] sm:$0xff] %v4387_v12 }
 0x2cf   : > { %v4393_v41 = vpop.f32.mrf.mxu0 }
 0x2d0   : > { %v4365_v53 = vpop.f32.mrf.mxu1  ;;  %4608 = vst [vmem:[#allocation21_spill] sm:$0xff] %v4393_v41 }
 0x2d1   : > { %v4395_v43 = vpop.f32.mrf.mxu0 }
 0x2d2   : > { %v4367_v52 = vpop.f32.mrf.mxu1  ;;  %4609 = vst [vmem:[#allocation22_spill] sm:$0xff] %v4395_v43  ;;  %v1429_v43 = vadd.f32 %v4276_v30, %v4328_v13 }
 0x2d3   : > { %v4397_v27 = vpop.f32.mrf.mxu0 }
 0x2d4   : > { %v1533_v9 = vpop.f32.mrf.mxu1  ;;  %4610 = vst [vmem:[#allocation23_spill] sm:$0xff] %v4397_v27  ;;  %v1431_v27 = vadd.f32 %v4278_v37, %v4336_v18 }
 0x2d5   : > { %v4403_v36 = vpop.f32.mrf.mxu0  ;;  %v1601_v41 = vadd.f32 %v1533_v9, %v1428_v3 }
 0x2d6   : > { %v1535_v4 = vpop.f32.mrf.mxu1  ;;  %4612 = vst [vmem:[#allocation25_spill] sm:$0xff] %v4403_v36  ;;  %v1432_v36 = vadd.f32 %v4282_v42, %v4340_v25 }
 0x2d7   : > { %v1768_v32 = vadd.f32 %v1700_v48, %v1601_v41 }
 0x2d8   : > { %v1537_v10 = vpop.f32.mrf.mxu1 }
 0x2d9   : > { %v1604_v20 = vadd.f32 %v1537_v10, %v1431_v27 }
 0x2da   : > { %v1539_v59 = vpop.f32.mrf.mxu1 }
 0x2db   : > { %v1605_v22 = vadd.f32 %v1539_v59, %v1432_v36  ;;  %v1771_v13 = vadd.f32 %v1704_v55, %v1604_v20  ;;  %v2299_v55 = vld [vmem:[%s3915_s27 + $0x18] sm:$0xff] }
 0x2dc   : > { %v4371_v61 = vpop.f32.mrf.mxu1 }
 0x2dd   : > { %v1772_v10 = vadd.f32 %v1706_v56, %v1605_v22  ;;  %v2300_v56 = vld [vmem:[%s3915_s27 + $0x20] sm:$0xff] }
 0x2de   : > { %v4373_v62 = vpop.f32.mrf.mxu1 }
 0x2e0   : > { %v4377_v1 = vpop.f32.mrf.mxu1 }
 0x2e2   : > { %v4379_v5 = vpop.f32.mrf.mxu1 }
 0x2e4   : > { %v4383_v6 = vpop.f32.mrf.mxu1 }
 0x2e6   : > { %v4385_v11 = vpop.f32.mrf.mxu1 }
 0x2e8   : > { %v4389_v31 = vpop.f32.mrf.mxu1 }
 0x2e9   : > { %4606 = vst [vmem:[#allocation19_spill] sm:$0xff] %v4389_v31 }
 0x2ea   : > { %v4391_v34 = vpop.f32.mrf.mxu1 }
 0x2eb   : > { %4607 = vst [vmem:[#allocation20_spill] sm:$0xff] %v4391_v34  ;;  %v2036_v34 = vpop.f32.mrf.mxu0 }
 0x2ec   : > { %v1873_v14 = vpop.f32.mrf.mxu1 }
 0x2ed   : > { %v1941_v9 = vadd.f32 %v1873_v14, %v1768_v32  ;;  %v2296_v32 = vld [vmem:[%s3915_s27] sm:$0xff] }
 0x2ee   : > { %v1875_v16 = vpop.f32.mrf.mxu1 }
 0x2ef   : > { %v2104_v59 = vadd.f32 %v2036_v34, %v1941_v9 }
 0x2f0   : > { %v1877_v19 = vpop.f32.mrf.mxu1 }
 0x2f2   : > { %v1879_v21 = vpop.f32.mrf.mxu1 }
 0x2f3   : > { %v1945_v25 = vadd.f32 %v1879_v21, %v1772_v10  ;;  %v1271_v10 = vadd.f32 %v4359_v24, %v4300_v58 }
 0x2f4   : > { %v4399_v23 = vpop.f32.mrf.mxu1 }
 0x2f6   : > { %v4401_v33 = vpop.f32.mrf.mxu1 }
 0x2f7   : > { %4611 = vst [vmem:[#allocation24_spill] sm:$0xff] %v4401_v33  ;;  %v1602_v33 = vadd.f32 %v1535_v4, %v1429_v43  ;;  %v1944_v4 = vadd.f32 %v1877_v19, %v1771_v13 }
 0x2f8   : > { %v4405_v38 = vpop.f32.mrf.mxu1 }
 0x2f9   : > { %4613 = vst [vmem:[#allocation26_spill] sm:$0xff] %v4405_v38  ;;  %v1769_v30 = vadd.f32 %v1702_v51, %v1602_v33 }
 0x2fa   : > { %v4409_v12 = vpop.f32.mrf.mxu1 }
 0x2fb   : > { %4614 = vst [vmem:[#allocation27_spill] sm:$0xff] %v4409_v12  ;;  %v2038_v12 = vpop.f32.mrf.mxu0  ;;  %v1942_v18 = vadd.f32 %v1875_v16, %v1769_v30  ;;  %v2297_v16 = vld [vmem:[%s3915_s27 + $0x8] sm:$0xff] }
 0x2fc   : > { %v4415_v31 = vpop.f32.mrf.mxu1 }
 0x2fd   : > { %v2040_v43 = vpop.f32.mrf.mxu0  ;;  %v2105_v27 = vadd.f32 %v2038_v12, %v1942_v18  ;;  %v1270_v18 = vadd.f32 %v4356_v46, %v4294_v44 }
 0x2fe   : > { %v4419_v38 = vpop.f32.mrf.mxu1  ;;  %v2107_v36 = vadd.f32 %v2040_v43, %v1944_v4  ;;  %v1436_v4 = vadd.f32 %v4361_v50, %v4302_v60  ;;  %v1430_v43 = vadd.f32 %v4363_v47, %v4311_v28  ;;  %v1435_v60 = vadd.f32 %v4290_v45, %v4352_v39 }
 0x2ff   : > { %v2042_v14 = vpop.f32.mrf.mxu0  ;;  %v1437_v58 = vadd.f32 %v4297_v63, %v1270_v18 }
 0x300   : > { %v4421_v3 = vpop.f32.mrf.mxu1 }
 0x301   : > { %4615 = vst [vmem:[#allocation28_spill] sm:$0xff] %v4421_v3  ;;  %v2046_v12 = vpop.f32.mrf.mxu0 }
 0x302   : > { %v4423_v37 = vpop.f32.mrf.mxu1 }
 0x303   : > { %4616 = vst [vmem:[#allocation29_spill] sm:$0xff] %v4423_v37  ;;  %v2108_v37 = vadd.f32 %v2042_v14, %v1945_v25  ;;  %v2048_v25 = vpop.f32.mrf.mxu0 }
 0x304   : > { %v2216_v42 = vpop.f32.mrf.mxu1 }
 0x305   : > { %v2284_v41 = vadd.f32 %v2216_v42, %v2104_v59  ;;  %v1266_v42 = vadd.f32 %v4270_v17, %v4316_v8  ;;  %v1438_v17 = vadd.f32 %v4305_v7, %v1271_v10  ;;  %v2050_v8 = vpop.f32.mrf.mxu0  ;;  %v4617_v7 = vld [vmem:[#allocation17_spill] sm:$0xff] }
 0x306   : > { %v2218_v48 = vpop.f32.mrf.mxu1 }
 0x307   : > { %v2285_v20 = vadd.f32 %v2218_v48, %v2105_v27  ;;  %v2308_v22 = vadd.f32 %v2296_v32, %v2284_v41  ;;  %v1433_v28 = vadd.f32 %v4367_v52, %v1266_v42  ;;  %v1611_v45 = vadd.f32 %v4379_v5, %v1438_v17  ;;  %v4620_v5 = vld [vmem:[#allocation21_spill] sm:$0xff]  ;;  %v2307_v17 = vld [vmem:[%s3915_s27 + $0x58] sm:$0xff] }
 0x308   : > { %v2220_v51 = vpop.f32.mrf.mxu1 }
 0x309   : > { %v2287_v33 = vadd.f32 %v2220_v51, %v2107_v36  ;;  %v2309_v3 = vadd.f32 %v2297_v16, %v2285_v20  ;;  %v4625_v51 = vld [vmem:[#allocation27_spill] sm:$0xff] }
 0x30a   : > { %v2222_v19 = vpop.f32.mrf.mxu1  ;;  %v4626_v16 = vld [vmem:[#allocation23_spill] sm:$0xff] }
 0x30b   : > { %v2311_v30 = vadd.f32 %v2299_v55, %v2287_v33  ;;  %v2288_v13 = vadd.f32 %v2222_v19, %v2108_v37  ;;  %v1434_v37 = vadd.f32 %v4286_v49, %v4348_v35  ;;  %v1609_v49 = vadd.f32 %v4320_v26, %v1436_v4  ;;  %v2304_v4 = vld [vmem:[%s3915_s27 + $0x40] sm:$0xff] }
 0x30c   : > { %v1608_v35 = vadd.f32 %v4373_v62, %v1435_v60  ;;  %v1606_v26 = vadd.f32 %v4354_v40, %v1433_v28  ;;  %v4624_v40 = vld [vmem:[#allocation22_spill] sm:$0xff]  ;;  %v4629_v28 = vld [vmem:[#allocation29_spill] sm:$0xff] }
 0x30d   : > { %v2320_v21 = vmax.f32 %v2308_v22, %v2311_v30  ;;  %v2312_v34 = vadd.f32 %v2300_v56, %v2288_v13  ;;  %v1607_v44 = vadd.f32 %v4371_v61, %v1434_v37  ;;  %v1776_v24 = vadd.f32 %v4383_v6, %v1609_v49  ;;  %v4618_v61 = vld [vmem:[#allocation19_spill] sm:$0xff]  ;;  %v4627_v56 = vld [vmem:[#allocation25_spill] sm:$0xff] }
 0x30e   : > { %v2298_v37 = vld [vmem:[%s3915_s27 + $0x10] sm:$0xff] }
 0x30f   : > { %v4429_v9 = vmax.f32 %v2309_v3, %v2312_v34  ;;  %v1272_v3 = vadd.f32 %v4268_v15, %v4309_v2  ;;  %v1610_v15 = vadd.f32 %v4377_v1, %v1437_v58  ;;  %v1603_v2 = vadd.f32 %v4332_v54, %v1430_v43  ;;  %v2052_v54 = vpop.f32.mrf.mxu0  ;;  %v4619_v1 = vld [vmem:[#allocation20_spill] sm:$0xff]  ;;  %v2305_v58 = vld [vmem:[%s3915_s27 + $0x48] sm:$0xff] }
 0x310   : > { %v1774_v39 = vadd.f32 %v4369_v57, %v1607_v44  ;;  %v1773_v6 = vadd.f32 %v4619_v1, %v1606_v26  ;;  %v1949_v59 = vadd.f32 %v4620_v5, %v1776_v24  ;;  %v4622_v57 = vld [vmem:[#allocation26_spill] sm:$0xff]  ;;  %v2321_v36 = vrot.slane %v2320_v21, 4 }
 0x311   : > { %v1439_v46 = vadd.f32 %v4365_v53, %v1272_v3  ;;  %v1770_v63 = vadd.f32 %v4385_v11, %v1603_v2  ;;  %v1775_v53 = vadd.f32 %v4375_v0, %v1608_v35  ;;  %v1777_v52 = vadd.f32 %v4617_v7, %v1610_v15  ;;  %v4621_v11 = vld [vmem:[#allocation24_spill] sm:$0xff]  ;;  %v2302_v44 = vld [vmem:[%s3915_s27 + $0x30] sm:$0xff]  ;;  %v2301_v26 = vld [vmem:[%s3915_s27 + $0x28] sm:$0xff] }
 0x312   : > { %v1947_v47 = vadd.f32 %v4399_v23, %v1774_v39  ;;  %v2112_v0 = vadd.f32 %v4415_v31, %v1949_v59  ;;  %v1946_v22 = vadd.f32 %v4627_v56, %v1773_v6  ;;  %v2328_v30 = vrot.slane %v4429_v9, 4  ;;  %v4628_v3 = vld [vmem:[#allocation28_spill] sm:$0xff]  ;;  %v2306_v39 = vld [vmem:[%s3915_s27 + $0x50] sm:$0xff] }
 0x313   : > { %v1612_v50 = vadd.f32 %v4344_v29, %v1439_v46  ;;  %v1948_v48 = vadd.f32 %v4621_v11, %v1775_v53  ;;  %v1950_v41 = vadd.f32 %v4622_v57, %v1777_v52  ;;  %v4623_v29 = vld [vmem:[#allocation18_spill] sm:$0xff]  ;;  %v1943_v23 = vadd.f32 %v4624_v40, %v1770_v63 }
 0x314   : > { %v1778_v27 = vadd.f32 %v4623_v29, %v1611_v45  ;;  %v2110_v33 = vadd.f32 %v2046_v12, %v1947_v47  ;;  %v2322_v42 = vmax.f32 %v2320_v21, %v2321_v36  ;;  %v2109_v49 = vadd.f32 %v4629_v28, %v1946_v22 }
 0x315   : > { %v1779_v62 = vadd.f32 %v4618_v61, %v1612_v50  ;;  %v2106_v20 = vadd.f32 %v4419_v38, %v1943_v23  ;;  %v2111_v10 = vadd.f32 %v2048_v25, %v1948_v48  ;;  %v2113_v38 = vadd.f32 %v2050_v8, %v1950_v41  ;;  %v2303_v8 = vld [vmem:[%s3915_s27 + $0x38] sm:$0xff]  ;;  %s487_s27 = scalar_lea.vmem %s4573_s6, %s3923_s15  ;;  %s2739_s15 = scalar_lea.sflag [#allocation4], %s3903_s11 }
 0x316   : > { %v1951_v55 = vadd.f32 %v4625_v51, %v1778_v27  ;;  %v2329_v2 = vmax.f32 %v4429_v9, %v2328_v30  ;;  %v2323_v61 = vrot.slane %v2322_v42, 2 }
 0x317   : > { %v1952_v19 = vadd.f32 %v4626_v16, %v1779_v62 }
 0x318   : > { %v2114_v25 = vadd.f32 %v2052_v54, %v1951_v55  ;;  %v2330_v59 = vrot.slane %v2329_v2, 2  ;;  %v2324_v23 = vmax.f32 %v2322_v42, %v2323_v61 }
 0x319   : > { %v2115_v12 = vadd.f32 %v4628_v3, %v1952_v19 }
 0x31a   : > { %v2331_v51 = vmax.f32 %v2329_v2, %v2330_v59  ;;  %v2325_v19 = vrot.slane %v2324_v23, 1  ;;  %v3492_v2 = vld [vmem:[%s3945_s25 + $0x30] sm:$0xff]  }
 0x320   : > { %v2226_v14 = vpop.f32.mrf.mxu1  ;;  %v3282_v32 = vpop.f32.mrf.mxu0 }
 0x321   : > { %v2292_v13 = vadd.f32 %v3282_v32, %v2112_v0  ;;  %v2290_v18 = vadd.f32 %v2226_v14, %v2110_v33 }
 0x322   : > { %v2228_v34 = vpop.f32.mrf.mxu1  ;;  %v2269_v31 = vpop.f32.mrf.mxu0 }
 0x323   : > { %v2286_v43 = vadd.f32 %v2269_v31, %v2106_v20  ;;  %v2291_v35 = vadd.f32 %v2228_v34, %v2111_v10  ;;  %v2316_v24 = vadd.f32 %v2304_v4, %v2292_v13  ;;  %v2314_v47 = vadd.f32 %v2302_v44, %v2290_v18 }
 0x324   : > { %v2230_v60 = vpop.f32.mrf.mxu1  ;;  %v3283_v46 = vpop.f32.mrf.mxu0  ;;  %v2332_v34 = vrot.slane %v2331_v51, 1 }
 0x325   : > { %v2293_v15 = vadd.f32 %v2230_v60, %v2113_v38  ;;  %v2310_v45 = vadd.f32 %v2298_v37, %v2286_v43  ;;  %v2295_v63 = vadd.f32 %v3283_v46, %v2115_v12  ;;  %v2315_v1 = vadd.f32 %v2303_v8, %v2291_v35  ;;  %v3493_v8 = vld [vmem:[%s3945_s25 + $0x28] sm:$0xff]  }
 0x326   : > { %v2232_v21 = vpop.f32.mrf.mxu1  ;;  %v2272_v50 = vpop.f32.mrf.mxu0  ;;  %v2358_v9 = vsel %vm2334_vm9, %v2316_v24, -inf  ;;  %v2326_v43 = vmax.f32 %v2324_v23, %v2325_v19  ;;  %v2333_v42 = vmax.f32 %v2331_v51, %v2332_v34  ;;  %v4630_v24 = vmov 0.0  }
 0x327   : > { %v2317_v53 = vadd.f32 %v2305_v58, %v2293_v15  ;;  %v2294_v7 = vadd.f32 %v2232_v21, %v2114_v25  ;;  %v2289_v52 = vadd.f32 %v2272_v50, %v2109_v49  ;;  %v2319_v62 = vadd.f32 %v2307_v17, %v2295_v63  ;;  %v3491_v15 = vld [vmem:[%s3945_s25 + $0x38] sm:$0xff]   ;;  %v3496_v21 = vld [vmem:[%s3945_s25 + $0x10] sm:$0xff]   ;;  %v3498_v50 = vld [vmem:[%s3945_s25] sm:$0xff]  }
 0x328   : > { %v2335_v11 = vsel %vm2334_vm9, %v2310_v45, -inf  ;;  %v3494_v45 = vld [vmem:[%s3945_s25 + $0x20] sm:$0xff]   ;;  %v3495_v63 = vld [vmem:[%s3945_s25 + $0x18] sm:$0xff]  }
 0x329   : > { %v2344_v6 = vmax.f32 %v2314_v47, %v2317_v53  ;;  %v2318_v5 = vadd.f32 %v2306_v39, %v2294_v7  ;;  %v2313_v54 = vadd.f32 %v2301_v26, %v2289_v52  ;;  %v2359_v48 = vsel %vm2334_vm9, %v2319_v62, -inf  ;;  %v3497_v39 = vld [vmem:[%s3945_s25 + $0x8] sm:$0xff]   ;;  %v3092_v53 = vld [vmem:[%s487_s27] ss:$0 sm:$0xff] }
 0x32a   : > { %v2360_v41 = vmax.f32 %v2358_v9, %v2359_v48  ;;  %v3114_v48 = vld [vmem:[%s495_s18] ss:$0 sm:$0xff] }
 0x32b   : > { %v2345_v57 = vrot.slane %v2344_v6, 4  ;;  %v2351_v29 = vmax.f32 %v2315_v1, %v2318_v5  ;;  %v2336_v27 = vsel %vm2334_vm9, %v2313_v54, -inf }
 0x32c   : > { %v2337_v40 = vmax.f32 %v2335_v11, %v2336_v27  ;;  %v2361_v36 = vrot.slane %v2360_v41, 4 }
 0x32d   : > { %v2346_v0 = vmax.f32 %v2344_v6, %v2345_v57  ;;  %v2352_v14 = vrot.slane %v2351_v29, 4 }
 0x32e   : > { %v2338_v32 = vrot.slane %v2337_v40, 4  ;;  %v2362_v20 = vmax.f32 %v2360_v41, %v2361_v36 }
 0x32f   : > { %v2347_v55 = vrot.slane %v2346_v0, 2  ;;  %v2353_v33 = vmax.f32 %v2351_v29, %v2352_v14 }
 0x330   : > { %v2339_v16 = vmax.f32 %v2337_v40, %v2338_v32  ;;  %v2363_v22 = vrot.slane %v2362_v20, 2 }
 0x331   : > { %v2348_v56 = vmax.f32 %v2346_v0, %v2347_v55  ;;  %v2354_v30 = vrot.slane %v2353_v33, 2 }
 0x332   : > { %v2340_v13 = vrot.slane %v2339_v16, 2  ;;  %v2364_v18 = vmax.f32 %v2362_v20, %v2363_v22 }
 0x333   : > { %v2349_v31 = vrot.slane %v2348_v56, 1  ;;  %v2355_v4 = vmax.f32 %v2353_v33, %v2354_v30 }
 0x334   : > { %v2341_v10 = vmax.f32 %v2339_v16, %v2340_v13  ;;  %v2365_v38 = vrot.slane %v2364_v18, 1 }
 0x335   : > { %v2350_v37 = vmax.f32 %v2348_v56, %v2349_v31  ;;  %v2356_v3 = vrot.slane %v2355_v4, 1 }
 0x336   : > { %v2342_v12 = vrot.slane %v2341_v10, 1  ;;  %v2366_v58 = vmax.f32 %v2364_v18, %v2365_v38 }
 0x337   : > { %v2357_v44 = vmax.f32 %v2355_v4, %v2356_v3  ;;  %v2368_v60 = vsel %vm2367_vm10, %v2326_v43, %v2350_v37 }
 0x338   : > { %v2343_v46 = vmax.f32 %v2341_v10, %v2342_v12  ;;  %v2371_v17 = vpack.c.bf16 %v2368_v60, %v2368_v60 }
 0x339   : > { %v2369_v28 = vsel %vm2367_vm10, %v2333_v42, %v2357_v44 }
 0x33a   : > { %v2370_v49 = vsel %vm2367_vm10, %v2343_v46, %v2366_v58  ;;  %v2372_v35 = vpack.c.bf16 %v2369_v28, %v2369_v28 }
 0x33b   : > { %v2373_v25 = vpack.c.bf16 %v2370_v49, %v2370_v49 }
 0x33c   : > { %2576 = vmatprep.mubr.bf16.mxu1 %v2372_v35 }
 0x33d   : > { %2577 = vmatmul.mubr.bf16.vlgmr.msra.gmra.mxu1 %v2371_v17  ;;  %3293 = vmatmul.mubr.msk.bf16.vlgmr.msra.gmra.mxu0 %vm2334_vm9, %v2373_v25 }
 0x33e   : > { %3297 = vmatpush3.bf16.msra.mxu0 %v3491_v15  ;;  %3312 = vmatprep.mubr.msk.bf16.mxu0 %vm3676_vm8, %v4630_v24 }
 0x33f   : > { %3298 = vmatprep.subr.bf16.mxu0 %v4630_v24 }
 0x342   : > { %3299 = vmatpush3.bf16.msra.mxu0 %v3492_v2 }
 0x343   : > { %3300 = vmatprep.subr.bf16.mxu0 %v4630_v24 }
 0x346   : > { %3301 = vmatpush3.bf16.msra.mxu0 %v3493_v8 }
 0x347   : > { %3302 = vmatprep.subr.bf16.mxu0 %v4630_v24 }
 0x34a   : > { %3303 = vmatpush3.bf16.msra.mxu0 %v3494_v45 }
 0x34b   : > { %3304 = vmatprep.subr.bf16.mxu0 %v4630_v24 }
 0x34e   : > { %3305 = vmatpush3.bf16.msra.mxu0 %v3495_v63 }
 0x34f   : > { %3306 = vmatprep.subr.bf16.mxu0 %v4630_v24 }
 0x352   : > { %3307 = vmatpush3.bf16.msra.mxu0 %v3496_v21 }
 0x353   : > { %3308 = vmatprep.subr.bf16.mxu0 %v4630_v24 }
 0x356   : > { %3309 = vmatpush3.bf16.msra.mxu0 %v3497_v39 }
 0x357   : > { %3310 = vmatprep.subr.bf16.mxu0 %v4630_v24 }
 0x35a   : > { %3311 = vmatpush3.bf16.msra.mxu0 %v3498_v50 }
 0x3fd   : > { %v3184_v26 = vpop.f32.mrf.mxu1  ;;  %v2618_v47 = vpop.f32.mrf.mxu0 }
 0x3ff   : > { %v3185_v7 = vpop.f32.mrf.mxu1  ;;  %v3294_v52 = vpop.f32.mrf.mxu0 }
 0x400   : > { %v3186_v61 = vadd.f32 %v3185_v7, %v3184_v26 }
 0x401   : > { %v3187_v62 = vpop.f32.mrf.mxu1  ;;  %v2621_v1 = vpop.f32.mrf.mxu0 }
 0x402   : > { %v2579_v6 = vadd.f32 %v3186_v61, %v3092_v53 }
 0x403   : > { %v3188_v5 = vpop.f32.mrf.mxu1  ;;  %v3295_v54 = vpop.f32.mrf.mxu0 }
 0x404   : > { %v2619_v59 = vadd.f32 %v2618_v47, %v2579_v6 }
 0x406   : > { %v2624_v9 = vmax.f32 %v2619_v59, 0.0 }
 0x408   : > { %v2625_v11 = vpack.c.bf16 %v2624_v9, %v2624_v9 }
 0x40a   : > { %3313 = vmatmul.mubr.bf16.vlgmr.msra.gmra.mxu0 %v2625_v11 }
 0x4ca   : > { %v2731_v57 = vpop.f32.mrf.mxu0 }
 0x4cb   : > { %v2732_v41 = vadd.f32 %v3114_v48, %v2731_v57 }
 0x4cc   : > { %v3314_v29 = vpop.f32.mrf.mxu0 }
 0x4cd   : > { %2737 = vst [vmem:[%s479_s24] sm:$0x3] %v2732_v41 }
 0x4ce   : > { %v2734_v27 = vpop.f32.mrf.mxu0 }
 0x4cf   : > { %3608 = shalt.err (!%p3605_p6)
}
 0x4d0   : > { %s3609_s23 = scalar_lea.hbm %s4524_s4, 32  ;;  %s3613_s29 = scalar_lea.hbm %s4576_s9, 64 }
 0x4d1   : > { %p3610_p0 = scmp.ne.s32.totalorder %s4524_s4, %s3609_s23  ;;  %p3614_p2 = scmp.lt.s32.totalorder %s4524_s4, %s4576_s9 }
 0x4d2   : > { %p3615_p5 = scmp.lt.s32.totalorder %s3613_s29, %s3609_s23 }
 0x4d3   : > { %p3611_p11 = pnand %p3610_p0, %p4631_p8 }
 0x4d4   : > { %p3616_p13 = por %p3615_p5, %p3614_p2 }
 0x4d5   : > { %p3612_p4 = pneg %p3611_p11 }
 0x4d7   : > { %p3617_p7 = pnand %p3616_p13, %p3612_p4 }
 0x4d9   : > { %3620 = shalt.err (!%p3617_p7)
}
 0x4da   : > { %3332 = dma.vmem_to_hbm [thread:$0]  (%p4631_p8), %s4526_s14, 32, %s4524_s4, %s2739_s15   ;;  %v3315_v40 = vpop.f32.mrf.mxu0 }
 0x4db PF: > { %s4632_s28 = sld [smem:[#allocation12_spill]]  ;;  %p4635_p1 = scmp.ge.s32.totalorder %s3663_s12, 2 }
 0x4dc   : > { %s4633_s16 = sld [smem:[#allocation16_spill]] }
 0x4e1   : > { %s2764_s18 = sand.u32 1, %s4632_s28  }
 0x4e2   : > { %p4634_p10 = scmp.ne.s32.totalorder %s4633_s16, 0  ;;  %s2765_s19 = scalar_lea.sflag [#allocation4], %s2764_s18 }
 0x4e4   : > { %p3345_p3 = pnand %p4635_p1, %p4634_p10 }
 0x4e6   : > { %p3346_p9 = pneg %p3345_p3 }
 0x4e8   : > { %3646 = dma.done.wait (%p3346_p9), %s2765_s19, 32  }
 0x4e9   : > { %3648 = vsyncadd (%p3346_p9), %s2765_s19, 4294967264  ;;  %s4636_s12 = sld [smem:[#allocation14_spill]]  ;;  %s4639_s30 = smov %s3655_s10 }
 0x4ea   : > { %s4637_s24 = sld [smem:[#allocation13_spill]] }
 0x4eb   : > { %s4638_s11 = sld [smem:[#allocation15_spill]] }
 0x4ef   : > { %p25_p12 = scmp.ge.s32.totalorder %s4636_s12, 4  }
 0x4f0   : > { %s4640_s10 = smov %s4637_s24 }
 0x4f1   :  { %27 = sbr.rel (!%p25_p12) target bundleno = 10 (0xa), region = 146 }
 0x4f6   :  { %2770 = vsyncpa [#allocation3], 1 }
 0x4f7   :  { %2772 = vsyncpa [#allocation3 + $0x1], 1 }
 0x4f8   :  { %2773 = vsyncpa [#allocation6], 1 }
 0x4f9   :  { %2775 = vsyncpa [#allocation6 + $0x1], 1 }
 0x4fa   :  { %2776 = vsyncpa [#allocation4], 1 }
 0x4fb   :  { %2778 = vsyncpa [#allocation4 + $0x1], 1 }

</bundles_post_ra>
